<compile_context>
chip_gen: v7x
topology: tpu7x:2x2x1
jax: 0.10.0
libtpu: 0.0.40
codegen_flags: <defaults>
</compile_context>

<pallas_src>
import math

import numpy as np
import jax
import jax.numpy as jnp
from jax import lax
from jax.experimental import pallas as pl
from jax.experimental.pallas import tpu as pltpu

# --- small, deterministic config consistent with the module's __init__ ---
NJOINTS = 5
NFEATS = 4
NFRAMES = 8
LATENT_DIM = 32
FF_SIZE = 64
NUM_LAYERS = 2
NUM_HEADS = 4
HEAD_DIM = LATENT_DIM // NUM_HEADS
INPUT_FEATS = NJOINTS * NFEATS          # 20
INPUT_FEATS_PAD = 24                    # padded to a sublane (8) multiple
LN_EPS = 1e-5
MAX_LEN = 5000

# ---- packed-slab layout (static offsets used inside the kernel) ----
WSLAB_COLS = 3 * LATENT_DIM                               # 96 lanes
LAYER_W_ROWS = 3 * LATENT_DIM + FF_SIZE                   # qkv(32)+wo(32)+w1(32)+w2(64)
WSLAB_ROWS = INPUT_FEATS_PAD + NUM_LAYERS * LAYER_W_ROWS  # 344
# per-layer bias/LN slab rows: [b_qkv, b_o, ln1_g, ln1_b, b1, b2, ln2_g, ln2_b]
PSLAB_ROWS_PER_LAYER = 8


def _layernorm(y, gamma, beta):
    mean = jnp.mean(y, axis=-1, keepdims=True)
    var = jnp.mean((y - mean) ** 2, axis=-1, keepdims=True)
    return (y - mean) * lax.rsqrt(var + LN_EPS) * gamma + beta


def _gelu_exact(x):
    # matches F.gelu (erf-based), which nn.TransformerEncoderLayer('gelu') uses
    return 0.5 * x * (1.0 + lax.erf(x * (1.0 / math.sqrt(2.0))))


# ---------------------------------------------------------------------------
# Fused kernel: embedding + PE/prefix + NUM_LAYERS transformer layers + mu
# (whole batch folded into sublanes of one stacked (B*S, D) activation)
# ---------------------------------------------------------------------------
def fused_encoder_kernel(x_ref, bias_ref, xadd_ref, wslab_ref, pslab_ref, mu_ref):
    D, F, H3 = LATENT_DIM, FF_SIZE, 3 * LATENT_DIM

    # block-diagonal key-padding bias (0 = attend, -1e30 = masked / other batch),
    # hoisted once and reused by every head of every layer.
    bias = bias_ref[...]                                               # (BS, BS)

    # skelEmbedding + [mu;sigma] query prepend + positional encoding in one
    # matmul: the mu/sigma rows of x are zero, so
    #   x @ W_skel + xadd == [muQ+pe0; sigQ+pe1; xW+b+pe]  (per batch element).
    skel_w = wslab_ref[0:INPUT_FEATS_PAD, 0:D]        # zero-padded rows are no-ops
    h = jnp.dot(x_ref[...], skel_w, preferred_element_type=jnp.float32) + xadd_ref[...]

    for l in range(NUM_LAYERS):                        # static unroll, L=2
        wb = INPUT_FEATS_PAD + l * LAYER_W_ROWS
        pb = l * PSLAB_ROWS_PER_LAYER
        w_qkv = wslab_ref[wb:wb + D, 0:H3]             # (D, 3D); 1/sqrt(hd) folded into Q cols
        w_o = wslab_ref[wb + D:wb + 2 * D, 0:D]        # (D, D)
        w_1 = wslab_ref[wb + 2 * D:wb + 3 * D, 0:F]    # (D, FF)
        w_2 = wslab_ref[wb + 3 * D:wb + 3 * D + F, 0:D]  # (FF, D)
        b_qkv = pslab_ref[pb + 0:pb + 1, 0:H3]
        b_o = pslab_ref[pb + 1:pb + 2, 0:D]
        ln1_g = pslab_ref[pb + 2:pb + 3, 0:D]
        ln1_b = pslab_ref[pb + 3:pb + 4, 0:D]
        b_1 = pslab_ref[pb + 4:pb + 5, 0:F]
        b_2 = pslab_ref[pb + 5:pb + 6, 0:D]
        ln2_g = pslab_ref[pb + 6:pb + 7, 0:D]
        ln2_b = pslab_ref[pb + 7:pb + 8, 0:D]

        # --- multi-head self-attention: one fused QKV matmul for all heads ---
        qkv = jnp.dot(h, w_qkv, preferred_element_type=jnp.float32) + b_qkv  # (BS, 3D)

        heads = []
        for hh in range(NUM_HEADS):                    # static unroll, H=4
            q = qkv[:, hh * HEAD_DIM:(hh + 1) * HEAD_DIM]
            k = qkv[:, D + hh * HEAD_DIM:D + (hh + 1) * HEAD_DIM]
            v = qkv[:, 2 * D + hh * HEAD_DIM:2 * D + (hh + 1) * HEAD_DIM]
            s = lax.dot_general(q, k, (((1,), (1,)), ((), ())),
                                preferred_element_type=jnp.float32) + bias   # (BS, BS)
            m = jnp.max(s, axis=-1, keepdims=True)
            p = jnp.exp(s - m)
            p = p / jnp.sum(p, axis=-1, keepdims=True)  # exact softmax (matches PyTorch)
            heads.append(jnp.dot(p, v, preferred_element_type=jnp.float32))  # (BS, hd)
        o = jnp.concatenate(heads, axis=-1)            # lane concat of head outputs (BS, D)
        attn = jnp.dot(o, w_o, preferred_element_type=jnp.float32) + b_o

        # post-norm residual blocks (dropout = identity in eval)
        h1 = _layernorm(h + attn, ln1_g, ln1_b)
        f = jnp.dot(h1, w_1, preferred_element_type=jnp.float32) + b_1
        f = _gelu_exact(f)
        f = jnp.dot(f, w_2, preferred_element_type=jnp.float32) + b_2
        h = _layernorm(h1 + f, ln2_g, ln2_b)

    # rows [0, B) of the stacked activation are the mu tokens -> single store
    mu_ref[...] = h[0:mu_ref.shape[0], :]


# ---------------------------------------------------------------------------
# Parameters (deterministic, synthetic) — pre-packed into 2 kernel slabs
# ---------------------------------------------------------------------------
def init_params(key):
    keys = jax.random.split(key, 3 + NUM_LAYERS)

    def normal(k, shape, s=0.02):
        return np.asarray((s * jax.random.normal(k, shape)).astype(jnp.float32))

    mu_q = jax.random.normal(keys[0], (1, LATENT_DIM), dtype=jnp.float32)
    sigma_q = jax.random.normal(keys[1], (1, LATENT_DIM), dtype=jnp.float32)

    # PositionalEncoding buffer (identical construction to the PyTorch module)
    position = np.arange(MAX_LEN, dtype=np.float32)[:, None]
    div_term = np.exp(np.arange(0, LATENT_DIM, 2, dtype=np.float32)
                      * (-np.log(10000.0) / LATENT_DIM))
    pe = np.zeros((MAX_LEN, LATENT_DIM), np.float32)
    pe[:, 0::2] = np.sin(position * div_term)
    pe[:, 1::2] = np.cos(position * div_term)

    skel_w_t = normal(keys[2], (INPUT_FEATS, LATENT_DIM))
    skel_b = np.zeros((1, LATENT_DIM), np.float32)

    scale = 1.0 / math.sqrt(HEAD_DIM)

    wslab = np.zeros((WSLAB_ROWS, WSLAB_COLS), np.float32)
    pslab = np.zeros((NUM_LAYERS * PSLAB_ROWS_PER_LAYER, WSLAB_COLS), np.float32)
    wslab[0:INPUT_FEATS, 0:LATENT_DIM] = skel_w_t     # rows 20..23 stay zero (pad)

    for l in range(NUM_LAYERS):
        lk = jax.random.split(keys[3 + l], 6)
        w_q = normal(lk[0], (LATENT_DIM, LATENT_DIM))   # input-major (D_in, D_out)
        w_k = normal(lk[1], (LATENT_DIM, LATENT_DIM))
        w_v = normal(lk[2], (LATENT_DIM, LATENT_DIM))
        w_o = normal(lk[3], (LATENT_DIM, LATENT_DIM))
        w_1 = normal(lk[4], (LATENT_DIM, FF_SIZE))
        w_2 = normal(lk[5], (FF_SIZE, LATENT_DIM))

        wb = INPUT_FEATS_PAD + l * LAYER_W_ROWS
        # fused QKV weight (D, 3D); 1/sqrt(head_dim) folded into the Q columns
        wslab[wb:wb + LATENT_DIM, 0:LATENT_DIM] = w_q * scale
        wslab[wb:wb + LATENT_DIM, LATENT_DIM:2 * LATENT_DIM] = w_k
        wslab[wb:wb + LATENT_DIM, 2 * LATENT_DIM:3 * LATENT_DIM] = w_v
        wslab[wb + LATENT_DIM:wb + 2 * LATENT_DIM, 0:LATENT_DIM] = w_o
        wslab[wb + 2 * LATENT_DIM:wb + 3 * LATENT_DIM, 0:FF_SIZE] = w_1
        wslab[wb + 3 * LATENT_DIM:wb + 3 * LATENT_DIM + FF_SIZE, 0:LATENT_DIM] = w_2

        pb = l * PSLAB_ROWS_PER_LAYER
        # biases (rows 0,1,3,4,5,7) are zero like the reference init; LN gammas = 1
        pslab[pb + 2, 0:LATENT_DIM] = 1.0               # ln1 gamma
        pslab[pb + 6, 0:LATENT_DIM] = 1.0               # ln2 gamma

    return {
        'wslab': jnp.asarray(wslab),
        'pslab': jnp.asarray(pslab),
        'mu_q': mu_q,
        'sigma_q': sigma_q,
        'pe': jnp.asarray(pe),
        'skel_b': jnp.asarray(skel_b),
    }


# ---------------------------------------------------------------------------
# Forward (all glue below is tiny and fused into one XLA program under jit)
# ---------------------------------------------------------------------------
def motion_clip_encoder_forward(params, x, mask):
    # x: (bs, njoints, nfeats, nframes), mask: (bs, nframes) bool
    bs, nj, nf, nframes = x.shape
    feats = nj * nf

    # Stacked-batch row layout (attention is permutation-equivariant and the PE
    # enters via xadd, so any row ordering consistent across x/xadd/bias works):
    #   rows [0, bs)        : mu query token of batch b   -> mu output rows
    #   rows [bs, 2*bs)     : sigma query token of batch b
    #   rows [2*bs + b*T+t] : frame t of batch b
    x_btf = jnp.transpose(x, (0, 3, 1, 2)).reshape(bs * nframes, feats)
    x_flat = jnp.concatenate(
        [jnp.zeros((2 * bs, feats), jnp.float32), x_btf.astype(jnp.float32)], axis=0)
    # pad feature axis to match the zero-padded rows of the skel weight block
    x_flat = jnp.pad(x_flat, ((0, 0), (0, INPUT_FEATS_PAD - feats)))

    # additive per-row term: [muQ+pe0 ; sigmaQ+pe1 ; skel_b+pe[2:2+T] (per batch)]
    pe = params['pe']
    xadd = jnp.concatenate([
        jnp.tile(params['mu_q'] + pe[0:1], (bs, 1)),
        jnp.tile(params['sigma_q'] + pe[1:2], (bs, 1)),
        jnp.tile(params['skel_b'] + pe[2:2 + nframes], (bs, 1)),
    ], axis=0)

    # block-diagonal additive key-padding bias over the stacked batch
    # (mu/sigma tokens always kept -> every query row has >=2 unmasked keys)
    row_batch = jnp.concatenate(
        [jnp.arange(bs), jnp.arange(bs), jnp.repeat(jnp.arange(bs), nframes)], axis=0)
    keep = jnp.concatenate(
        [jnp.ones((2 * bs,), jnp.float32),
         mask.astype(jnp.float32).reshape(bs * nframes)], axis=0)
    same = row_batch[:, None] == row_batch[None, :]
    bias = jnp.where(same & (keep[None, :] > 0.5), 0.0, -1e30).astype(jnp.float32)

    # TODO(synk): dropout (positional encoding + transformer layers) omitted —
    # inference/eval semantics.
    vspec = pl.BlockSpec(memory_space=pltpu.MemorySpace.VMEM)
    mu = pl.pallas_call(
        fused_encoder_kernel,
        out_shape=jax.ShapeDtypeStruct((bs, LATENT_DIM), jnp.float32),
        in_specs=[vspec] * 5,
        out_specs=vspec,
    )(x_flat, bias, xadd, params['wslab'], params['pslab'])
    return {'mu': mu}


if __name__ == "__main__":
    key = jax.random.PRNGKey(0)
    pkey, xkey = jax.random.split(key)
    params = init_params(pkey)

    bs = 2
    x = jax.random.normal(xkey, (bs, NJOINTS, NFEATS, NFRAMES), dtype=jnp.float32)
    mask = jnp.ones((bs, NFRAMES), dtype=bool)   # lengths_to_mask with full lengths

    forward = jax.jit(motion_clip_encoder_forward)
    out = forward(params, x, mask)
    mu = jax.block_until_ready(out['mu'])
    assert mu.shape == (bs, LATENT_DIM)
    assert bool(jnp.all(jnp.isfinite(mu)))
    print("KERNEL_OK")
</pallas_src>

<mosaic_0001>
module attributes {stable_mosaic.version = 11 : i64} {
  func.func @fused_encoder_kernel(%arg0: memref<20x24xf32, #tpu.memory_space<vmem>>, %arg1: memref<20x20xf32, #tpu.memory_space<vmem>>, %arg2: memref<20x32xf32, #tpu.memory_space<vmem>>, %arg3: memref<344x96xf32, #tpu.memory_space<vmem>>, %arg4: memref<16x96xf32, #tpu.memory_space<vmem>>, %arg5: memref<2x32xf32, #tpu.memory_space<vmem>>) attributes {dimension_semantics = [], scalar_prefetch = 0 : i64, scratch_operands = 0 : i64, tpu.core_type = #tpu.core_type<tc>} {
    %c0 = arith.constant 0 : index
    %c0_0 = arith.constant 0 : index
    %0 = vector.load %arg1[%c0, %c0_0] : memref<20x20xf32, #tpu.memory_space<vmem>>, vector<20x20xf32>
    %c0_1 = arith.constant 0 : index
    %c0_2 = arith.constant 0 : index
    %1 = vector.load %arg3[%c0_1, %c0_2] : memref<344x96xf32, #tpu.memory_space<vmem>>, vector<24x32xf32>
    %c0_3 = arith.constant 0 : index
    %c0_4 = arith.constant 0 : index
    %2 = vector.load %arg0[%c0_3, %c0_4] : memref<20x24xf32, #tpu.memory_space<vmem>>, vector<20x24xf32>
    %cst = arith.constant dense<0.000000e+00> : vector<20x32xf32>
    %3 = tpu.matmul %2, %1, %cst {dimension_numbers = #tpu.dot_dimension_numbers<[1], [0], [0], [1], [0, 0, 1, 1], [], []>} : vector<20x24xf32>, vector<24x32xf32>, vector<20x32xf32> -> vector<20x32xf32>
    %c0_5 = arith.constant 0 : index
    %c0_6 = arith.constant 0 : index
    %4 = vector.load %arg2[%c0_5, %c0_6] : memref<20x32xf32, #tpu.memory_space<vmem>>, vector<20x32xf32>
    %5 = arith.addf %3, %4 : vector<20x32xf32>
    %c24 = arith.constant 24 : index
    %c0_7 = arith.constant 0 : index
    %6 = vector.load %arg3[%c24, %c0_7] : memref<344x96xf32, #tpu.memory_space<vmem>>, vector<32x96xf32>
    %c56 = arith.constant 56 : index
    %c0_8 = arith.constant 0 : index
    %7 = vector.load %arg3[%c56, %c0_8] : memref<344x96xf32, #tpu.memory_space<vmem>>, vector<32x32xf32>
    %c88 = arith.constant 88 : index
    %c0_9 = arith.constant 0 : index
    %8 = vector.load %arg3[%c88, %c0_9] : memref<344x96xf32, #tpu.memory_space<vmem>>, vector<32x64xf32>
    %c120 = arith.constant 120 : index
    %c0_10 = arith.constant 0 : index
    %9 = vector.load %arg3[%c120, %c0_10] : memref<344x96xf32, #tpu.memory_space<vmem>>, vector<64x32xf32>
    %c0_11 = arith.constant 0 : index
    %c0_12 = arith.constant 0 : index
    %10 = vector.load %arg4[%c0_11, %c0_12] : memref<16x96xf32, #tpu.memory_space<vmem>>, vector<1x96xf32>
    %c1 = arith.constant 1 : index
    %c0_13 = arith.constant 0 : index
    %11 = vector.load %arg4[%c1, %c0_13] : memref<16x96xf32, #tpu.memory_space<vmem>>, vector<1x32xf32>
    %c2 = arith.constant 2 : index
    %c0_14 = arith.constant 0 : index
    %12 = vector.load %arg4[%c2, %c0_14] : memref<16x96xf32, #tpu.memory_space<vmem>>, vector<1x32xf32>
    %c3 = arith.constant 3 : index
    %c0_15 = arith.constant 0 : index
    %13 = vector.load %arg4[%c3, %c0_15] : memref<16x96xf32, #tpu.memory_space<vmem>>, vector<1x32xf32>
    %c4 = arith.constant 4 : index
    %c0_16 = arith.constant 0 : index
    %14 = vector.load %arg4[%c4, %c0_16] : memref<16x96xf32, #tpu.memory_space<vmem>>, vector<1x64xf32>
    %c5 = arith.constant 5 : index
    %c0_17 = arith.constant 0 : index
    %15 = vector.load %arg4[%c5, %c0_17] : memref<16x96xf32, #tpu.memory_space<vmem>>, vector<1x32xf32>
    %c6 = arith.constant 6 : index
    %c0_18 = arith.constant 0 : index
    %16 = vector.load %arg4[%c6, %c0_18] : memref<16x96xf32, #tpu.memory_space<vmem>>, vector<1x32xf32>
    %c7 = arith.constant 7 : index
    %c0_19 = arith.constant 0 : index
    %17 = vector.load %arg4[%c7, %c0_19] : memref<16x96xf32, #tpu.memory_space<vmem>>, vector<1x32xf32>
    %cst_20 = arith.constant dense<0.000000e+00> : vector<20x96xf32>
    %18 = tpu.matmul %5, %6, %cst_20 {dimension_numbers = #tpu.dot_dimension_numbers<[1], [0], [0], [1], [0, 0, 1, 1], [], []>} : vector<20x32xf32>, vector<32x96xf32>, vector<20x96xf32> -> vector<20x96xf32>
    %19 = vector.broadcast %10 : vector<1x96xf32> to vector<20x96xf32>
    %20 = arith.addf %18, %19 : vector<20x96xf32>
    %21 = vector.extract_strided_slice %20 {offsets = [0, 0], sizes = [20, 8], strides = [1, 1]} : vector<20x96xf32> to vector<20x8xf32>
    %22 = vector.extract_strided_slice %20 {offsets = [0, 32], sizes = [20, 8], strides = [1, 1]} : vector<20x96xf32> to vector<20x8xf32>
    %23 = vector.extract_strided_slice %20 {offsets = [0, 64], sizes = [20, 8], strides = [1, 1]} : vector<20x96xf32> to vector<20x8xf32>
    %cst_21 = arith.constant dense<0.000000e+00> : vector<20x20xf32>
    %24 = tpu.matmul %21, %22, %cst_21 {dimension_numbers = #tpu.dot_dimension_numbers<[1], [1], [0], [0], [0, 0, 1, 0], [], []>} : vector<20x8xf32>, vector<20x8xf32>, vector<20x20xf32> -> vector<20x20xf32>
    %25 = arith.addf %24, %0 : vector<20x20xf32>
    %cst_22 = arith.constant dense<0xFF800000> : vector<20xf32>
    %26 = vector.multi_reduction <maximumf>, %25, %cst_22 [1] : vector<20x20xf32> to vector<20xf32>
    %27 = vector.shape_cast %26 : vector<20xf32> to vector<20x1xf32>
    %28 = vector.broadcast %27 : vector<20x1xf32> to vector<20x20xf32>
    %29 = arith.subf %25, %28 : vector<20x20xf32>
    %30 = math.exp %29 : vector<20x20xf32>
    %cst_23 = arith.constant dense<0.000000e+00> : vector<20xf32>
    %31 = vector.multi_reduction <add>, %30, %cst_23 [1] : vector<20x20xf32> to vector<20xf32>
    %32 = vector.shape_cast %31 : vector<20xf32> to vector<20x1xf32>
    %33 = vector.broadcast %32 : vector<20x1xf32> to vector<20x20xf32>
    %34 = arith.divf %30, %33 : vector<20x20xf32>
    %cst_24 = arith.constant dense<0.000000e+00> : vector<20x8xf32>
    %35 = tpu.matmul %34, %23, %cst_24 {dimension_numbers = #tpu.dot_dimension_numbers<[1], [0], [0], [1], [0, 0, 1, 1], [], []>} : vector<20x20xf32>, vector<20x8xf32>, vector<20x8xf32> -> vector<20x8xf32>
    %36 = vector.extract_strided_slice %20 {offsets = [0, 8], sizes = [20, 8], strides = [1, 1]} : vector<20x96xf32> to vector<20x8xf32>
    %37 = vector.extract_strided_slice %20 {offsets = [0, 40], sizes = [20, 8], strides = [1, 1]} : vector<20x96xf32> to vector<20x8xf32>
    %38 = vector.extract_strided_slice %20 {offsets = [0, 72], sizes = [20, 8], strides = [1, 1]} : vector<20x96xf32> to vector<20x8xf32>
    %cst_25 = arith.constant dense<0.000000e+00> : vector<20x20xf32>
    %39 = tpu.matmul %36, %37, %cst_25 {dimension_numbers = #tpu.dot_dimension_numbers<[1], [1], [0], [0], [0, 0, 1, 0], [], []>} : vector<20x8xf32>, vector<20x8xf32>, vector<20x20xf32> -> vector<20x20xf32>
    %40 = arith.addf %39, %0 : vector<20x20xf32>
    %cst_26 = arith.constant dense<0xFF800000> : vector<20xf32>
    %41 = vector.multi_reduction <maximumf>, %40, %cst_26 [1] : vector<20x20xf32> to vector<20xf32>
    %42 = vector.shape_cast %41 : vector<20xf32> to vector<20x1xf32>
    %43 = vector.broadcast %42 : vector<20x1xf32> to vector<20x20xf32>
    %44 = arith.subf %40, %43 : vector<20x20xf32>
    %45 = math.exp %44 : vector<20x20xf32>
    %cst_27 = arith.constant dense<0.000000e+00> : vector<20xf32>
    %46 = vector.multi_reduction <add>, %45, %cst_27 [1] : vector<20x20xf32> to vector<20xf32>
    %47 = vector.shape_cast %46 : vector<20xf32> to vector<20x1xf32>
    %48 = vector.broadcast %47 : vector<20x1xf32> to vector<20x20xf32>
    %49 = arith.divf %45, %48 : vector<20x20xf32>
    %cst_28 = arith.constant dense<0.000000e+00> : vector<20x8xf32>
    %50 = tpu.matmul %49, %38, %cst_28 {dimension_numbers = #tpu.dot_dimension_numbers<[1], [0], [0], [1], [0, 0, 1, 1], [], []>} : vector<20x20xf32>, vector<20x8xf32>, vector<20x8xf32> -> vector<20x8xf32>
    %51 = vector.extract_strided_slice %20 {offsets = [0, 16], sizes = [20, 8], strides = [1, 1]} : vector<20x96xf32> to vector<20x8xf32>
    %52 = vector.extract_strided_slice %20 {offsets = [0, 48], sizes = [20, 8], strides = [1, 1]} : vector<20x96xf32> to vector<20x8xf32>
    %53 = vector.extract_strided_slice %20 {offsets = [0, 80], sizes = [20, 8], strides = [1, 1]} : vector<20x96xf32> to vector<20x8xf32>
    %cst_29 = arith.constant dense<0.000000e+00> : vector<20x20xf32>
    %54 = tpu.matmul %51, %52, %cst_29 {dimension_numbers = #tpu.dot_dimension_numbers<[1], [1], [0], [0], [0, 0, 1, 0], [], []>} : vector<20x8xf32>, vector<20x8xf32>, vector<20x20xf32> -> vector<20x20xf32>
    %55 = arith.addf %54, %0 : vector<20x20xf32>
    %cst_30 = arith.constant dense<0xFF800000> : vector<20xf32>
    %56 = vector.multi_reduction <maximumf>, %55, %cst_30 [1] : vector<20x20xf32> to vector<20xf32>
    %57 = vector.shape_cast %56 : vector<20xf32> to vector<20x1xf32>
    %58 = vector.broadcast %57 : vector<20x1xf32> to vector<20x20xf32>
    %59 = arith.subf %55, %58 : vector<20x20xf32>
    %60 = math.exp %59 : vector<20x20xf32>
    %cst_31 = arith.constant dense<0.000000e+00> : vector<20xf32>
    %61 = vector.multi_reduction <add>, %60, %cst_31 [1] : vector<20x20xf32> to vector<20xf32>
    %62 = vector.shape_cast %61 : vector<20xf32> to vector<20x1xf32>
    %63 = vector.broadcast %62 : vector<20x1xf32> to vector<20x20xf32>
    %64 = arith.divf %60, %63 : vector<20x20xf32>
    %cst_32 = arith.constant dense<0.000000e+00> : vector<20x8xf32>
    %65 = tpu.matmul %64, %53, %cst_32 {dimension_numbers = #tpu.dot_dimension_numbers<[1], [0], [0], [1], [0, 0, 1, 1], [], []>} : vector<20x20xf32>, vector<20x8xf32>, vector<20x8xf32> -> vector<20x8xf32>
    %66 = vector.extract_strided_slice %20 {offsets = [0, 24], sizes = [20, 8], strides = [1, 1]} : vector<20x96xf32> to vector<20x8xf32>
    %67 = vector.extract_strided_slice %20 {offsets = [0, 56], sizes = [20, 8], strides = [1, 1]} : vector<20x96xf32> to vector<20x8xf32>
    %68 = vector.extract_strided_slice %20 {offsets = [0, 88], sizes = [20, 8], strides = [1, 1]} : vector<20x96xf32> to vector<20x8xf32>
    %cst_33 = arith.constant dense<0.000000e+00> : vector<20x20xf32>
    %69 = tpu.matmul %66, %67, %cst_33 {dimension_numbers = #tpu.dot_dimension_numbers<[1], [1], [0], [0], [0, 0, 1, 0], [], []>} : vector<20x8xf32>, vector<20x8xf32>, vector<20x20xf32> -> vector<20x20xf32>
    %70 = arith.addf %69, %0 : vector<20x20xf32>
    %cst_34 = arith.constant dense<0xFF800000> : vector<20xf32>
    %71 = vector.multi_reduction <maximumf>, %70, %cst_34 [1] : vector<20x20xf32> to vector<20xf32>
    %72 = vector.shape_cast %71 : vector<20xf32> to vector<20x1xf32>
    %73 = vector.broadcast %72 : vector<20x1xf32> to vector<20x20xf32>
    %74 = arith.subf %70, %73 : vector<20x20xf32>
    %75 = math.exp %74 : vector<20x20xf32>
    %cst_35 = arith.constant dense<0.000000e+00> : vector<20xf32>
    %76 = vector.multi_reduction <add>, %75, %cst_35 [1] : vector<20x20xf32> to vector<20xf32>
    %77 = vector.shape_cast %76 : vector<20xf32> to vector<20x1xf32>
    %78 = vector.broadcast %77 : vector<20x1xf32> to vector<20x20xf32>
    %79 = arith.divf %75, %78 : vector<20x20xf32>
    %cst_36 = arith.constant dense<0.000000e+00> : vector<20x8xf32>
    %80 = tpu.matmul %79, %68, %cst_36 {dimension_numbers = #tpu.dot_dimension_numbers<[1], [0], [0], [1], [0, 0, 1, 1], [], []>} : vector<20x20xf32>, vector<20x8xf32>, vector<20x8xf32> -> vector<20x8xf32>
    %81 = tpu.concatenate %35, %50, %65, %80 in 1 : vector<20x8xf32>, vector<20x8xf32>, vector<20x8xf32>, vector<20x8xf32> -> vector<20x32xf32>
    %cst_37 = arith.constant dense<0.000000e+00> : vector<20x32xf32>
    %82 = tpu.matmul %81, %7, %cst_37 {dimension_numbers = #tpu.dot_dimension_numbers<[1], [0], [0], [1], [0, 0, 1, 1], [], []>} : vector<20x32xf32>, vector<32x32xf32>, vector<20x32xf32> -> vector<20x32xf32>
    %83 = vector.broadcast %11 : vector<1x32xf32> to vector<20x32xf32>
    %84 = arith.addf %82, %83 : vector<20x32xf32>
    %85 = arith.addf %5, %84 : vector<20x32xf32>
    %cst_38 = arith.constant dense<0.000000e+00> : vector<20xf32>
    %86 = vector.multi_reduction <add>, %85, %cst_38 [1] : vector<20x32xf32> to vector<20xf32>
    %87 = vector.shape_cast %86 : vector<20xf32> to vector<20x1xf32>
    %cst_39 = arith.constant 3.200000e+01 : f32
    %88 = vector.broadcast %cst_39 : f32 to vector<20x1xf32>
    %89 = arith.divf %87, %88 : vector<20x1xf32>
    %90 = vector.broadcast %89 : vector<20x1xf32> to vector<20x32xf32>
    %91 = arith.subf %85, %90 : vector<20x32xf32>
    %92 = arith.mulf %91, %91 : vector<20x32xf32>
    %cst_40 = arith.constant dense<0.000000e+00> : vector<20xf32>
    %93 = vector.multi_reduction <add>, %92, %cst_40 [1] : vector<20x32xf32> to vector<20xf32>
    %94 = vector.shape_cast %93 : vector<20xf32> to vector<20x1xf32>
    %cst_41 = arith.constant 3.200000e+01 : f32
    %95 = vector.broadcast %cst_41 : f32 to vector<20x1xf32>
    %96 = arith.divf %94, %95 : vector<20x1xf32>
    %97 = vector.broadcast %89 : vector<20x1xf32> to vector<20x32xf32>
    %98 = arith.subf %85, %97 : vector<20x32xf32>
    %cst_42 = arith.constant 9.99999974E-6 : f32
    %99 = vector.broadcast %cst_42 : f32 to vector<20x1xf32>
    %100 = arith.addf %96, %99 : vector<20x1xf32>
    %101 = math.rsqrt %100 : vector<20x1xf32>
    %102 = vector.broadcast %101 : vector<20x1xf32> to vector<20x32xf32>
    %103 = arith.mulf %98, %102 : vector<20x32xf32>
    %104 = vector.broadcast %12 : vector<1x32xf32> to vector<20x32xf32>
    %105 = arith.mulf %103, %104 : vector<20x32xf32>
    %106 = vector.broadcast %13 : vector<1x32xf32> to vector<20x32xf32>
    %107 = arith.addf %105, %106 : vector<20x32xf32>
    %cst_43 = arith.constant dense<0.000000e+00> : vector<20x64xf32>
    %108 = tpu.matmul %107, %8, %cst_43 {dimension_numbers = #tpu.dot_dimension_numbers<[1], [0], [0], [1], [0, 0, 1, 1], [], []>} : vector<20x32xf32>, vector<32x64xf32>, vector<20x64xf32> -> vector<20x64xf32>
    %109 = vector.broadcast %14 : vector<1x64xf32> to vector<20x64xf32>
    %110 = arith.addf %108, %109 : vector<20x64xf32>
    %cst_44 = arith.constant 5.000000e-01 : f32
    %111 = vector.broadcast %cst_44 : f32 to vector<20x64xf32>
    %112 = arith.mulf %111, %110 : vector<20x64xf32>
    %cst_45 = arith.constant 0.707106769 : f32
    %113 = vector.broadcast %cst_45 : f32 to vector<20x64xf32>
    %114 = arith.mulf %110, %113 : vector<20x64xf32>
    %115 = math.erf %114 : vector<20x64xf32>
    %cst_46 = arith.constant 1.000000e+00 : f32
    %116 = vector.broadcast %cst_46 : f32 to vector<20x64xf32>
    %117 = arith.addf %116, %115 : vector<20x64xf32>
    %118 = arith.mulf %112, %117 : vector<20x64xf32>
    %cst_47 = arith.constant dense<0.000000e+00> : vector<20x32xf32>
    %119 = tpu.matmul %118, %9, %cst_47 {dimension_numbers = #tpu.dot_dimension_numbers<[1], [0], [0], [1], [0, 0, 1, 1], [], []>} : vector<20x64xf32>, vector<64x32xf32>, vector<20x32xf32> -> vector<20x32xf32>
    %120 = vector.broadcast %15 : vector<1x32xf32> to vector<20x32xf32>
    %121 = arith.addf %119, %120 : vector<20x32xf32>
    %122 = arith.addf %107, %121 : vector<20x32xf32>
    %cst_48 = arith.constant dense<0.000000e+00> : vector<20xf32>
    %123 = vector.multi_reduction <add>, %122, %cst_48 [1] : vector<20x32xf32> to vector<20xf32>
    %124 = vector.shape_cast %123 : vector<20xf32> to vector<20x1xf32>
    %cst_49 = arith.constant 3.200000e+01 : f32
    %125 = vector.broadcast %cst_49 : f32 to vector<20x1xf32>
    %126 = arith.divf %124, %125 : vector<20x1xf32>
    %127 = vector.broadcast %126 : vector<20x1xf32> to vector<20x32xf32>
    %128 = arith.subf %122, %127 : vector<20x32xf32>
    %129 = arith.mulf %128, %128 : vector<20x32xf32>
    %cst_50 = arith.constant dense<0.000000e+00> : vector<20xf32>
    %130 = vector.multi_reduction <add>, %129, %cst_50 [1] : vector<20x32xf32> to vector<20xf32>
    %131 = vector.shape_cast %130 : vector<20xf32> to vector<20x1xf32>
    %cst_51 = arith.constant 3.200000e+01 : f32
    %132 = vector.broadcast %cst_51 : f32 to vector<20x1xf32>
    %133 = arith.divf %131, %132 : vector<20x1xf32>
    %134 = vector.broadcast %126 : vector<20x1xf32> to vector<20x32xf32>
    %135 = arith.subf %122, %134 : vector<20x32xf32>
    %cst_52 = arith.constant 9.99999974E-6 : f32
    %136 = vector.broadcast %cst_52 : f32 to vector<20x1xf32>
    %137 = arith.addf %133, %136 : vector<20x1xf32>
    %138 = math.rsqrt %137 : vector<20x1xf32>
    %139 = vector.broadcast %138 : vector<20x1xf32> to vector<20x32xf32>
    %140 = arith.mulf %135, %139 : vector<20x32xf32>
    %141 = vector.broadcast %16 : vector<1x32xf32> to vector<20x32xf32>
    %142 = arith.mulf %140, %141 : vector<20x32xf32>
    %143 = vector.broadcast %17 : vector<1x32xf32> to vector<20x32xf32>
    %144 = arith.addf %142, %143 : vector<20x32xf32>
    %c184 = arith.constant 184 : index
    %c0_53 = arith.constant 0 : index
    %145 = vector.load %arg3[%c184, %c0_53] : memref<344x96xf32, #tpu.memory_space<vmem>>, vector<32x96xf32>
    %c216 = arith.constant 216 : index
    %c0_54 = arith.constant 0 : index
    %146 = vector.load %arg3[%c216, %c0_54] : memref<344x96xf32, #tpu.memory_space<vmem>>, vector<32x32xf32>
    %c248 = arith.constant 248 : index
    %c0_55 = arith.constant 0 : index
    %147 = vector.load %arg3[%c248, %c0_55] : memref<344x96xf32, #tpu.memory_space<vmem>>, vector<32x64xf32>
    %c280 = arith.constant 280 : index
    %c0_56 = arith.constant 0 : index
    %148 = vector.load %arg3[%c280, %c0_56] : memref<344x96xf32, #tpu.memory_space<vmem>>, vector<64x32xf32>
    %c8 = arith.constant 8 : index
    %c0_57 = arith.constant 0 : index
    %149 = vector.load %arg4[%c8, %c0_57] : memref<16x96xf32, #tpu.memory_space<vmem>>, vector<1x96xf32>
    %c9 = arith.constant 9 : index
    %c0_58 = arith.constant 0 : index
    %150 = vector.load %arg4[%c9, %c0_58] : memref<16x96xf32, #tpu.memory_space<vmem>>, vector<1x32xf32>
    %c10 = arith.constant 10 : index
    %c0_59 = arith.constant 0 : index
    %151 = vector.load %arg4[%c10, %c0_59] : memref<16x96xf32, #tpu.memory_space<vmem>>, vector<1x32xf32>
    %c11 = arith.constant 11 : index
    %c0_60 = arith.constant 0 : index
    %152 = vector.load %arg4[%c11, %c0_60] : memref<16x96xf32, #tpu.memory_space<vmem>>, vector<1x32xf32>
    %c12 = arith.constant 12 : index
    %c0_61 = arith.constant 0 : index
    %153 = vector.load %arg4[%c12, %c0_61] : memref<16x96xf32, #tpu.memory_space<vmem>>, vector<1x64xf32>
    %c13 = arith.constant 13 : index
    %c0_62 = arith.constant 0 : index
    %154 = vector.load %arg4[%c13, %c0_62] : memref<16x96xf32, #tpu.memory_space<vmem>>, vector<1x32xf32>
    %c14 = arith.constant 14 : index
    %c0_63 = arith.constant 0 : index
    %155 = vector.load %arg4[%c14, %c0_63] : memref<16x96xf32, #tpu.memory_space<vmem>>, vector<1x32xf32>
    %c15 = arith.constant 15 : index
    %c0_64 = arith.constant 0 : index
    %156 = vector.load %arg4[%c15, %c0_64] : memref<16x96xf32, #tpu.memory_space<vmem>>, vector<1x32xf32>
    %cst_65 = arith.constant dense<0.000000e+00> : vector<20x96xf32>
    %157 = tpu.matmul %144, %145, %cst_65 {dimension_numbers = #tpu.dot_dimension_numbers<[1], [0], [0], [1], [0, 0, 1, 1], [], []>} : vector<20x32xf32>, vector<32x96xf32>, vector<20x96xf32> -> vector<20x96xf32>
    %158 = vector.broadcast %149 : vector<1x96xf32> to vector<20x96xf32>
    %159 = arith.addf %157, %158 : vector<20x96xf32>
    %160 = vector.extract_strided_slice %159 {offsets = [0, 0], sizes = [20, 8], strides = [1, 1]} : vector<20x96xf32> to vector<20x8xf32>
    %161 = vector.extract_strided_slice %159 {offsets = [0, 32], sizes = [20, 8], strides = [1, 1]} : vector<20x96xf32> to vector<20x8xf32>
    %162 = vector.extract_strided_slice %159 {offsets = [0, 64], sizes = [20, 8], strides = [1, 1]} : vector<20x96xf32> to vector<20x8xf32>
    %cst_66 = arith.constant dense<0.000000e+00> : vector<20x20xf32>
    %163 = tpu.matmul %160, %161, %cst_66 {dimension_numbers = #tpu.dot_dimension_numbers<[1], [1], [0], [0], [0, 0, 1, 0], [], []>} : vector<20x8xf32>, vector<20x8xf32>, vector<20x20xf32> -> vector<20x20xf32>
    %164 = arith.addf %163, %0 : vector<20x20xf32>
    %cst_67 = arith.constant dense<0xFF800000> : vector<20xf32>
    %165 = vector.multi_reduction <maximumf>, %164, %cst_67 [1] : vector<20x20xf32> to vector<20xf32>
    %166 = vector.shape_cast %165 : vector<20xf32> to vector<20x1xf32>
    %167 = vector.broadcast %166 : vector<20x1xf32> to vector<20x20xf32>
    %168 = arith.subf %164, %167 : vector<20x20xf32>
    %169 = math.exp %168 : vector<20x20xf32>
    %cst_68 = arith.constant dense<0.000000e+00> : vector<20xf32>
    %170 = vector.multi_reduction <add>, %169, %cst_68 [1] : vector<20x20xf32> to vector<20xf32>
    %171 = vector.shape_cast %170 : vector<20xf32> to vector<20x1xf32>
    %172 = vector.broadcast %171 : vector<20x1xf32> to vector<20x20xf32>
    %173 = arith.divf %169, %172 : vector<20x20xf32>
    %cst_69 = arith.constant dense<0.000000e+00> : vector<20x8xf32>
    %174 = tpu.matmul %173, %162, %cst_69 {dimension_numbers = #tpu.dot_dimension_numbers<[1], [0], [0], [1], [0, 0, 1, 1], [], []>} : vector<20x20xf32>, vector<20x8xf32>, vector<20x8xf32> -> vector<20x8xf32>
    %175 = vector.extract_strided_slice %159 {offsets = [0, 8], sizes = [20, 8], strides = [1, 1]} : vector<20x96xf32> to vector<20x8xf32>
    %176 = vector.extract_strided_slice %159 {offsets = [0, 40], sizes = [20, 8], strides = [1, 1]} : vector<20x96xf32> to vector<20x8xf32>
    %177 = vector.extract_strided_slice %159 {offsets = [0, 72], sizes = [20, 8], strides = [1, 1]} : vector<20x96xf32> to vector<20x8xf32>
    %cst_70 = arith.constant dense<0.000000e+00> : vector<20x20xf32>
    %178 = tpu.matmul %175, %176, %cst_70 {dimension_numbers = #tpu.dot_dimension_numbers<[1], [1], [0], [0], [0, 0, 1, 0], [], []>} : vector<20x8xf32>, vector<20x8xf32>, vector<20x20xf32> -> vector<20x20xf32>
    %179 = arith.addf %178, %0 : vector<20x20xf32>
    %cst_71 = arith.constant dense<0xFF800000> : vector<20xf32>
    %180 = vector.multi_reduction <maximumf>, %179, %cst_71 [1] : vector<20x20xf32> to vector<20xf32>
    %181 = vector.shape_cast %180 : vector<20xf32> to vector<20x1xf32>
    %182 = vector.broadcast %181 : vector<20x1xf32> to vector<20x20xf32>
    %183 = arith.subf %179, %182 : vector<20x20xf32>
    %184 = math.exp %183 : vector<20x20xf32>
    %cst_72 = arith.constant dense<0.000000e+00> : vector<20xf32>
    %185 = vector.multi_reduction <add>, %184, %cst_72 [1] : vector<20x20xf32> to vector<20xf32>
    %186 = vector.shape_cast %185 : vector<20xf32> to vector<20x1xf32>
    %187 = vector.broadcast %186 : vector<20x1xf32> to vector<20x20xf32>
    %188 = arith.divf %184, %187 : vector<20x20xf32>
    %cst_73 = arith.constant dense<0.000000e+00> : vector<20x8xf32>
    %189 = tpu.matmul %188, %177, %cst_73 {dimension_numbers = #tpu.dot_dimension_numbers<[1], [0], [0], [1], [0, 0, 1, 1], [], []>} : vector<20x20xf32>, vector<20x8xf32>, vector<20x8xf32> -> vector<20x8xf32>
    %190 = vector.extract_strided_slice %159 {offsets = [0, 16], sizes = [20, 8], strides = [1, 1]} : vector<20x96xf32> to vector<20x8xf32>
    %191 = vector.extract_strided_slice %159 {offsets = [0, 48], sizes = [20, 8], strides = [1, 1]} : vector<20x96xf32> to vector<20x8xf32>
    %192 = vector.extract_strided_slice %159 {offsets = [0, 80], sizes = [20, 8], strides = [1, 1]} : vector<20x96xf32> to vector<20x8xf32>
    %cst_74 = arith.constant dense<0.000000e+00> : vector<20x20xf32>
    %193 = tpu.matmul %190, %191, %cst_74 {dimension_numbers = #tpu.dot_dimension_numbers<[1], [1], [0], [0], [0, 0, 1, 0], [], []>} : vector<20x8xf32>, vector<20x8xf32>, vector<20x20xf32> -> vector<20x20xf32>
    %194 = arith.addf %193, %0 : vector<20x20xf32>
    %cst_75 = arith.constant dense<0xFF800000> : vector<20xf32>
    %195 = vector.multi_reduction <maximumf>, %194, %cst_75 [1] : vector<20x20xf32> to vector<20xf32>
    %196 = vector.shape_cast %195 : vector<20xf32> to vector<20x1xf32>
    %197 = vector.broadcast %196 : vector<20x1xf32> to vector<20x20xf32>
    %198 = arith.subf %194, %197 : vector<20x20xf32>
    %199 = math.exp %198 : vector<20x20xf32>
    %cst_76 = arith.constant dense<0.000000e+00> : vector<20xf32>
    %200 = vector.multi_reduction <add>, %199, %cst_76 [1] : vector<20x20xf32> to vector<20xf32>
    %201 = vector.shape_cast %200 : vector<20xf32> to vector<20x1xf32>
    %202 = vector.broadcast %201 : vector<20x1xf32> to vector<20x20xf32>
    %203 = arith.divf %199, %202 : vector<20x20xf32>
    %cst_77 = arith.constant dense<0.000000e+00> : vector<20x8xf32>
    %204 = tpu.matmul %203, %192, %cst_77 {dimension_numbers = #tpu.dot_dimension_numbers<[1], [0], [0], [1], [0, 0, 1, 1], [], []>} : vector<20x20xf32>, vector<20x8xf32>, vector<20x8xf32> -> vector<20x8xf32>
    %205 = vector.extract_strided_slice %159 {offsets = [0, 24], sizes = [20, 8], strides = [1, 1]} : vector<20x96xf32> to vector<20x8xf32>
    %206 = vector.extract_strided_slice %159 {offsets = [0, 56], sizes = [20, 8], strides = [1, 1]} : vector<20x96xf32> to vector<20x8xf32>
    %207 = vector.extract_strided_slice %159 {offsets = [0, 88], sizes = [20, 8], strides = [1, 1]} : vector<20x96xf32> to vector<20x8xf32>
    %cst_78 = arith.constant dense<0.000000e+00> : vector<20x20xf32>
    %208 = tpu.matmul %205, %206, %cst_78 {dimension_numbers = #tpu.dot_dimension_numbers<[1], [1], [0], [0], [0, 0, 1, 0], [], []>} : vector<20x8xf32>, vector<20x8xf32>, vector<20x20xf32> -> vector<20x20xf32>
    %209 = arith.addf %208, %0 : vector<20x20xf32>
    %cst_79 = arith.constant dense<0xFF800000> : vector<20xf32>
    %210 = vector.multi_reduction <maximumf>, %209, %cst_79 [1] : vector<20x20xf32> to vector<20xf32>
    %211 = vector.shape_cast %210 : vector<20xf32> to vector<20x1xf32>
    %212 = vector.broadcast %211 : vector<20x1xf32> to vector<20x20xf32>
    %213 = arith.subf %209, %212 : vector<20x20xf32>
    %214 = math.exp %213 : vector<20x20xf32>
    %cst_80 = arith.constant dense<0.000000e+00> : vector<20xf32>
    %215 = vector.multi_reduction <add>, %214, %cst_80 [1] : vector<20x20xf32> to vector<20xf32>
    %216 = vector.shape_cast %215 : vector<20xf32> to vector<20x1xf32>
    %217 = vector.broadcast %216 : vector<20x1xf32> to vector<20x20xf32>
    %218 = arith.divf %214, %217 : vector<20x20xf32>
    %cst_81 = arith.constant dense<0.000000e+00> : vector<20x8xf32>
    %219 = tpu.matmul %218, %207, %cst_81 {dimension_numbers = #tpu.dot_dimension_numbers<[1], [0], [0], [1], [0, 0, 1, 1], [], []>} : vector<20x20xf32>, vector<20x8xf32>, vector<20x8xf32> -> vector<20x8xf32>
    %220 = tpu.concatenate %174, %189, %204, %219 in 1 : vector<20x8xf32>, vector<20x8xf32>, vector<20x8xf32>, vector<20x8xf32> -> vector<20x32xf32>
    %cst_82 = arith.constant dense<0.000000e+00> : vector<20x32xf32>
    %221 = tpu.matmul %220, %146, %cst_82 {dimension_numbers = #tpu.dot_dimension_numbers<[1], [0], [0], [1], [0, 0, 1, 1], [], []>} : vector<20x32xf32>, vector<32x32xf32>, vector<20x32xf32> -> vector<20x32xf32>
    %222 = vector.broadcast %150 : vector<1x32xf32> to vector<20x32xf32>
    %223 = arith.addf %221, %222 : vector<20x32xf32>
    %224 = arith.addf %144, %223 : vector<20x32xf32>
    %cst_83 = arith.constant dense<0.000000e+00> : vector<20xf32>
    %225 = vector.multi_reduction <add>, %224, %cst_83 [1] : vector<20x32xf32> to vector<20xf32>
    %226 = vector.shape_cast %225 : vector<20xf32> to vector<20x1xf32>
    %cst_84 = arith.constant 3.200000e+01 : f32
    %227 = vector.broadcast %cst_84 : f32 to vector<20x1xf32>
    %228 = arith.divf %226, %227 : vector<20x1xf32>
    %229 = vector.broadcast %228 : vector<20x1xf32> to vector<20x32xf32>
    %230 = arith.subf %224, %229 : vector<20x32xf32>
    %231 = arith.mulf %230, %230 : vector<20x32xf32>
    %cst_85 = arith.constant dense<0.000000e+00> : vector<20xf32>
    %232 = vector.multi_reduction <add>, %231, %cst_85 [1] : vector<20x32xf32> to vector<20xf32>
    %233 = vector.shape_cast %232 : vector<20xf32> to vector<20x1xf32>
    %cst_86 = arith.constant 3.200000e+01 : f32
    %234 = vector.broadcast %cst_86 : f32 to vector<20x1xf32>
    %235 = arith.divf %233, %234 : vector<20x1xf32>
    %236 = vector.broadcast %228 : vector<20x1xf32> to vector<20x32xf32>
    %237 = arith.subf %224, %236 : vector<20x32xf32>
    %cst_87 = arith.constant 9.99999974E-6 : f32
    %238 = vector.broadcast %cst_87 : f32 to vector<20x1xf32>
    %239 = arith.addf %235, %238 : vector<20x1xf32>
    %240 = math.rsqrt %239 : vector<20x1xf32>
    %241 = vector.broadcast %240 : vector<20x1xf32> to vector<20x32xf32>
    %242 = arith.mulf %237, %241 : vector<20x32xf32>
    %243 = vector.broadcast %151 : vector<1x32xf32> to vector<20x32xf32>
    %244 = arith.mulf %242, %243 : vector<20x32xf32>
    %245 = vector.broadcast %152 : vector<1x32xf32> to vector<20x32xf32>
    %246 = arith.addf %244, %245 : vector<20x32xf32>
    %cst_88 = arith.constant dense<0.000000e+00> : vector<20x64xf32>
    %247 = tpu.matmul %246, %147, %cst_88 {dimension_numbers = #tpu.dot_dimension_numbers<[1], [0], [0], [1], [0, 0, 1, 1], [], []>} : vector<20x32xf32>, vector<32x64xf32>, vector<20x64xf32> -> vector<20x64xf32>
    %248 = vector.broadcast %153 : vector<1x64xf32> to vector<20x64xf32>
    %249 = arith.addf %247, %248 : vector<20x64xf32>
    %cst_89 = arith.constant 5.000000e-01 : f32
    %250 = vector.broadcast %cst_89 : f32 to vector<20x64xf32>
    %251 = arith.mulf %250, %249 : vector<20x64xf32>
    %cst_90 = arith.constant 0.707106769 : f32
    %252 = vector.broadcast %cst_90 : f32 to vector<20x64xf32>
    %253 = arith.mulf %249, %252 : vector<20x64xf32>
    %254 = math.erf %253 : vector<20x64xf32>
    %cst_91 = arith.constant 1.000000e+00 : f32
    %255 = vector.broadcast %cst_91 : f32 to vector<20x64xf32>
    %256 = arith.addf %255, %254 : vector<20x64xf32>
    %257 = arith.mulf %251, %256 : vector<20x64xf32>
    %cst_92 = arith.constant dense<0.000000e+00> : vector<20x32xf32>
    %258 = tpu.matmul %257, %148, %cst_92 {dimension_numbers = #tpu.dot_dimension_numbers<[1], [0], [0], [1], [0, 0, 1, 1], [], []>} : vector<20x64xf32>, vector<64x32xf32>, vector<20x32xf32> -> vector<20x32xf32>
    %259 = vector.broadcast %154 : vector<1x32xf32> to vector<20x32xf32>
    %260 = arith.addf %258, %259 : vector<20x32xf32>
    %261 = arith.addf %246, %260 : vector<20x32xf32>
    %cst_93 = arith.constant dense<0.000000e+00> : vector<20xf32>
    %262 = vector.multi_reduction <add>, %261, %cst_93 [1] : vector<20x32xf32> to vector<20xf32>
    %263 = vector.shape_cast %262 : vector<20xf32> to vector<20x1xf32>
    %cst_94 = arith.constant 3.200000e+01 : f32
    %264 = vector.broadcast %cst_94 : f32 to vector<20x1xf32>
    %265 = arith.divf %263, %264 : vector<20x1xf32>
    %266 = vector.broadcast %265 : vector<20x1xf32> to vector<20x32xf32>
    %267 = arith.subf %261, %266 : vector<20x32xf32>
    %268 = arith.mulf %267, %267 : vector<20x32xf32>
    %cst_95 = arith.constant dense<0.000000e+00> : vector<20xf32>
    %269 = vector.multi_reduction <add>, %268, %cst_95 [1] : vector<20x32xf32> to vector<20xf32>
    %270 = vector.shape_cast %269 : vector<20xf32> to vector<20x1xf32>
    %cst_96 = arith.constant 3.200000e+01 : f32
    %271 = vector.broadcast %cst_96 : f32 to vector<20x1xf32>
    %272 = arith.divf %270, %271 : vector<20x1xf32>
    %273 = vector.broadcast %265 : vector<20x1xf32> to vector<20x32xf32>
    %274 = arith.subf %261, %273 : vector<20x32xf32>
    %cst_97 = arith.constant 9.99999974E-6 : f32
    %275 = vector.broadcast %cst_97 : f32 to vector<20x1xf32>
    %276 = arith.addf %272, %275 : vector<20x1xf32>
    %277 = math.rsqrt %276 : vector<20x1xf32>
    %278 = vector.broadcast %277 : vector<20x1xf32> to vector<20x32xf32>
    %279 = arith.mulf %274, %278 : vector<20x32xf32>
    %280 = vector.broadcast %155 : vector<1x32xf32> to vector<20x32xf32>
    %281 = arith.mulf %279, %280 : vector<20x32xf32>
    %282 = vector.broadcast %156 : vector<1x32xf32> to vector<20x32xf32>
    %283 = arith.addf %281, %282 : vector<20x32xf32>
    %284 = vector.extract_strided_slice %283 {offsets = [0, 0], sizes = [2, 32], strides = [1, 1]} : vector<20x32xf32> to vector<2x32xf32>
    %c0_98 = arith.constant 0 : index
    %c0_99 = arith.constant 0 : index
    %285 = vector.load %arg5[%c0_98, %c0_99] : memref<2x32xf32, #tpu.memory_space<vmem>>, vector<2x32xf32>
    tpu.vector_store %arg5[%c0_98, %c0_99], %284 {strides = array<i32>} : memref<2x32xf32, #tpu.memory_space<vmem>>, vector<2x32xf32>,
    return
  }
}

</mosaic_0001>

<bundles_post_ra>
// kernel: motion_clip_encoder_forward.1
= control target key start
LH: loop header
LB: loop body
LE: loop exit
PB: predicated region body
PF: predicated region fallthrough
CT: control target
= control target key end

     0   :  { %v4212_v2 = vmov 0.0|0.0   ;;  %vm4213_vm0 = vmmov 0   ;;  %v4214_v4 = vmov 0.0   ;;  %s5235_s0 = inlined_call_operand.vmem [shape: f32[20,24], index: 0, kind: input, shape index: {}]   ;;  %s5236_s1 = inlined_call_operand.vmem [shape: f32[20,20], index: 1, kind: input, shape index: {}]   ;;  %s5237_s2 = inlined_call_operand.vmem [shape: f32[20,32], index: 2, kind: input, shape index: {}]   ;;  %s5238_s3 = inlined_call_operand.vmem [shape: f32[344,96], index: 3, kind: input, shape index: {}]   ;;  %s5239_s4 = inlined_call_operand.vmem [shape: f32[16,96], index: 4, kind: input, shape index: {}]   ;;  %s5240_s5 = inlined_call_operand.hbm [shape: f32[2,32], index: 5, kind: output, shape index: {}]  }
   0x1   :  { %v24_v0 = vld [vmem:[%s5238_s3] sm:$0xff]  ;;  %v25_v1 = vld [vmem:[%s5238_s3 + $0x8] sm:$0xff]  ;;  %3836 = vmatprep.subr.bf16.mxu0 %v4212_v2  ;;  %3435 = vmatprep.mubr.msk.f32.mxu0 %vm4213_vm0, %v4214_v4  ;;  %v123_v5 = vld [vmem:[%s5238_s3 + $0x18] sm:$0xff] }
   0x2   :  { %v3837_v3 = vpack.c.bf16 %v25_v1, %v24_v0  ;;  %3839 = vmatprep.subr.bf16.mxu1 %v4212_v2  ;;  %v124_v6 = vld [vmem:[%s5238_s3 + $0x20] sm:$0xff]  ;;  %3452 = vmatprep.mubr.msk.f32.mxu1 %vm4213_vm0, %v4214_v4 }
   0x3   :  { %v3840_v7 = vpack.c.bf16 %v124_v6, %v123_v5 }
   0x4   :  { %3838 = vmatpush3.bf16.msra.mxu0 %v3837_v3 }
   0x5   :  { %10 = vsyncpa [#allocation3], 0  ;;  %3433 = vmatprep.subr.mxu0 %v4214_v4  ;;  %v26_v8 = vld [vmem:[%s5238_s3 + $0x10] sm:$0xff]  ;;  %v27_v9 = vld [vmem:[%s5235_s0] sm:$0xff]  ;;  %vm33_vm1 = vcmask 195584   ;;  %3841 = vmatpush3.bf16.msra.mxu1 %v3840_v7  ;;  %vm155_vm2 = vcmask 261120  }
   0x6   :  { %3842 = vmatprep.subr.bf16.mxu1 %v4212_v2  ;;  %v28_v10 = vld [vmem:[%s5235_s0 + $0x8] sm:$0xff]  ;;  %v29_v11 = vld [vmem:[%s5235_s0 + $0x10] sm:$0xf]  ;;  %v30_v15 = vld [vmem:[%s5237_s2] sm:$0xff]  ;;  %s4215_s19 = smov 88   ;;  %s4216_s20 = smov 96  }
   0x7   :  { %v125_v12 = vld [vmem:[%s5238_s3 + $0x28] sm:$0xff]  ;;  %v126_v13 = vld [vmem:[%s5238_s3 + $0x30] sm:$0xff]  ;;  %v3143_v29 = vld [vmem:[%s5239_s4] ss:$0 sm:$0xff]  ;;  %s4217_s21 = smov 120   ;;  %s4218_s22 = smov 80  }
   0x8   :  { %3434 = vmatpush3.msra.mxu0 %v26_v8  ;;  %v3843_v14 = vpack.c.bf16 %v126_v13, %v125_v12  ;;  %v31_v19 = vld [vmem:[%s5237_s2 + $0x8] sm:$0xff]  ;;  %v32_v23 = vld [vmem:[%s5237_s2 + $0x10] sm:$0xf]  ;;  %s4219_s23 = smov 72   ;;  %s4220_s24 = smov 112   ;;  %vm254_vm3 = vcmask 64512  }
   0x9   :  { %3436 = vmatmul.mubr.msk.f32.vlgmr.msra.gmra.mrb[0].mxu0 %vm33_vm1, %v27_v9  ;;  %3845 = vmatprep.subr.bf16.mxu0 %v4212_v2  ;;  %s4221_s25 = smov 104   ;;  %vm4373_vm4 = vmpackc.low %vm254_vm3, %vm254_vm3  ;;  %v21_v6 = vld [vmem:[%s5236_s1] sm:$0xff]  ;;  %vm347_vm5 = vcmask 162816   ;;  %vm354_vm6 = vcmask 158720   ;;  %s4222_s7 = smov 64   ;;  %vm399_vm7 = vcmask 1043456  }
   0xa   :  { %3438 = vmatprep.mubr.msk.f32.mxu0 %vm4213_vm0, %v4214_v4  ;;  %3844 = vmatpush3.bf16.msra.mxu1 %v3843_v14  ;;  %s4223_s8 = smov 56   ;;  %s4224_s9 = smov 48   ;;  %vm1229_vm8 = vcmask 130048   ;;  %vm1338_vm9 = vcmask 257024   ;;  %vm1499_vm10 = vcmask 523264   ;;  %vm3124_vm11 = vcmask 254976  }
   0xb   :  { %3849 = vmatprep.subr.bf16.mxu1 %v4212_v2  ;;  %s4225_s10 = smov 40   ;;  %s4226_s18 = smov 8  }
   0xc   :  { %s4227_s2 = smov 16   ;;  %s4228_s26 = smov 24  }
   0xd   :  { %3439 = vmatmul.mubr.msk.f32.gmra.mrb[2].mxu0 %vm33_vm1, %v28_v10  ;;  %v22_v10 = vld [vmem:[%s5236_s1 + $0x8] sm:$0xff]  ;;  %s4229_s6 = smov [#allocation2]  }
   0xe   :  { %3441 = vmatprep.mubr.msk.f32.mxu0 %vm4213_vm0, %v4214_v4  ;;  %s3132_s11 = sshll.u32 %s4229_s6, 4  ;;  %s3133_s11 = int_to_ptr.vmem [resolvable:$true] %s3132_s11 }
   0xf   :  { %s4188_s12 = scalar_lea.vmem %s3133_s11, 32  ;;  %p4193_p1 = scmp.lt.s32.totalorder %s3133_s11, %s3133_s11 }
  0x10   :  { %p4189_p0 = scmp.ne.s32.totalorder %s3133_s11, %s4188_s12  ;;  %p4194_p2 = scmp.lt.s32.totalorder %s4188_s12, %s4188_s12 }
  0x11   :  { %3442 = vmatmul.mubr.msk.f32.gmra.mrb[4].mxu0 %vm33_vm1, %v29_v11 }
  0x12   :  { %3467 = vmatprep.mubr.msk.f32.mxu0 %vm4213_vm0, %v4214_v4  ;;  %p4195_p3 = por %p4194_p2, %p4193_p1 }
  0x14   :  { %p4196_p4 = pnand %p4195_p3, %p4189_p0 }
  0xdc   :  { %v109_v16 = vpop.f32.mrb[0].mxu0 }
  0xdd   :  { %v4312_v17 = vadd.f32 %v109_v16, %v30_v15  ;;  %v3437_v18 = vpop.f32.mrb[1].mxu0  ;;  %v23_v15 = vld [vmem:[%s5236_s1 + $0x10] sm:$0xf] }
  0xdf   :  { %3453 = vmatmul.mubr.msk.f32.vlgmr.msra.gmra.mrb[0].mxu1 %vm155_vm2, %v4312_v17 }
  0xe0   :  { %v114_v20 = vpop.f32.mrb[2].mxu0  ;;  %3455 = vmatprep.mubr.msk.f32.mxu1 %vm4213_vm0, %v4214_v4 }
  0xe1   :  { %v4321_v21 = vadd.f32 %v114_v20, %v31_v19  ;;  %v3440_v22 = vpop.f32.mrb[3].mxu0 }
  0xe3   :  { %3456 = vmatmul.mubr.msk.f32.gmra.mrb[2].mxu1 %vm155_vm2, %v4321_v21 }
  0xe4   :  { %v119_v24 = vpop.f32.mrb[4].mxu0  ;;  %3458 = vmatprep.mubr.msk.f32.mxu1 %vm4213_vm0, %v4214_v4 }
  0xe5   :  { %v4330_v25 = vadd.f32 %v119_v24, %v32_v23  ;;  %v3443_v26 = vpop.f32.mrb[5].mxu0 }
  0xe7   :  { %3459 = vmatmul.mubr.msk.f32.gmra.mrb[4].mxu1 %vm155_vm2, %v4330_v25 }
  0xe8   :  { %3482 = vmatprep.mubr.msk.f32.mxu1 %vm4213_vm0, %v4214_v4 }
 0x1b2   :  { %v231_v27 = vpop.f32.mrb[0].mxu1 }
 0x1b3   :  { %v3454_v28 = vpop.f32.mrb[1].mxu1  ;;  %v232_v31 = vadd.f32 %v3143_v29, %v231_v27 }
 0x1b6   :  { %v236_v30 = vpop.f32.mrb[2].mxu1 }
 0x1b7   :  { %v237_v32 = vadd.f32 %v3143_v29, %v236_v30  ;;  %v3457_v33 = vpop.f32.mrb[3].mxu1 }
 0x1b9   :  { %v4339_v34 = vpack.i.bf16 %v237_v32, %v232_v31 }
 0x1ba   :  { %v241_v35 = vpop.f32.mrb[4].mxu1 }
 0x1bb   :  { %3983 = vrot.lane.b32.xlu1 %v4339_v34, %s4215_s19  ;;  %3978 = vrot.lane.b32.xlu0 %v4339_v34, %s4216_s20  ;;  %v4345_v36 = vadd.f32 %v3143_v29, %v241_v35  ;;  %v3460_v37 = vpop.f32.mrb[5].mxu1 }
 0x1bf   :  { %492 = vrot.lane.b32.xlu1 %v4345_v36, %s4215_s19  ;;  %252 = vrot.lane.b32.xlu0 %v4345_v36, %s4216_s20 }
 0x1c3   :  { %482 = vrot.lane.b32.xlu1 %v232_v31, %s4217_s21  ;;  %3988 = vrot.lane.b32.xlu0 %v4339_v34, %s4218_s22 }
 0x1c7   :  { %486 = vrot.lane.b32.xlu1 %v4345_v36, %s4217_s21  ;;  %484 = vrot.lane.b32.xlu0 %v237_v32, %s4217_s21 }
 0x1cb   :  { %3993 = vrot.lane.b32.xlu1 %v4339_v34, %s4219_s23  ;;  %728 = vrot.lane.b32.xlu0 %v4345_v36, %s4218_s22 }
 0x1cf   :  { %720 = vrot.lane.b32.xlu1 %v237_v32, %s4220_s24  ;;  %718 = vrot.lane.b32.xlu0 %v232_v31, %s4220_s24 }
 0x1d3   :  { %964 = vrot.lane.b32.xlu1 %v4345_v36, %s4219_s23  ;;  %722 = vrot.lane.b32.xlu0 %v4345_v36, %s4220_s24 }
 0x1d7   :  { %956 = vrot.lane.b32.xlu1 %v237_v32, %s4221_s25  ;;  %954 = vrot.lane.b32.xlu0 %v232_v31, %s4221_s25 }
 0x1db   :  { %958 = vrot.lane.b32.xlu0 %v4345_v36, %s4221_s25 }
 0x22d   :  { %v3979_v38 = vpop.permute.xlu0 %3978  ;;  %v3984_v43 = vpop.permute.xlu1 %3983 }
 0x22e   :  { %v3981_v39 = vunpack.i.h.bf16 %v3979_v38  ;;  %v3980_v40 = vunpack.i.l.bf16 %v3979_v38  ;;  %v3986_v44 = vunpack.i.h.bf16 %v3984_v43  ;;  %v3985_v45 = vunpack.i.l.bf16 %v3984_v43 }
 0x230   :  { %v3846_v42 = vpack.c.bf16 %v3981_v39, %v3980_v40  ;;  %v3853_v48 = vpack.c.bf16 %v3986_v44, %v3985_v45 }
 0x231   :  { %v253_v46 = vpop.permute.xlu0 %252  ;;  %v493_v47 = vpop.permute.xlu1 %492 }
 0x232   :  { %3848 = vmatpush3.bf16.xpose.msk.msra.mxu0 %vm4373_vm4, %v3846_v42 }
 0x233   :  { %3465 = vmatprep.subr.mxu0 %v4214_v4 }
 0x235   :  { %v483_v49 = vpop.permute.xlu1 %482  ;;  %v3989_v50 = vpop.permute.xlu0 %3988 }
 0x236   :  { %v3991_v51 = vunpack.i.h.bf16 %v3989_v50  ;;  %v3990_v52 = vunpack.i.l.bf16 %v3989_v50 }
 0x238   :  { %v3860_v54 = vpack.c.bf16 %v3991_v51, %v3990_v52 }
 0x239   :  { %v487_v53 = vpop.permute.xlu1 %486  ;;  %v485_v55 = vpop.permute.xlu0 %484 }
 0x23a   :  { %3466 = vmatpush3.xpose.msk.msra.mxu0 %vm254_vm3, %v253_v46 }
 0x23b   :  { %3852 = vmatprep.subr.bf16.mxu0 %v4212_v2 }
 0x23d   :  { %3468 = vmatmul.mubr.msk.f32.vlgmr.msra.gmra.mrb[6].mxu0 %vm254_vm3, %v232_v31  ;;  %v3994_v56 = vpop.permute.xlu1 %3993  ;;  %v729_v57 = vpop.permute.xlu0 %728 }
 0x23e   :  { %3855 = vmatpush3.bf16.xpose.msk.msra.mxu0 %vm4373_vm4, %v3853_v48  ;;  %3470 = vmatprep.mubr.msk.f32.mxu0 %vm4213_vm0, %v4214_v4  ;;  %v3996_v58 = vunpack.i.h.bf16 %v3994_v56  ;;  %v3995_v59 = vunpack.i.l.bf16 %v3994_v56 }
 0x23f   :  { %3495 = vmatprep.subr.mxu0 %v4214_v4 }
 0x240   :  { %v3867_v60 = vpack.c.bf16 %v3996_v58, %v3995_v59 }
 0x241   :  { %3471 = vmatmul.mubr.msk.f32.gmra.mrb[8].mxu0 %vm254_vm3, %v237_v32  ;;  %v719_v61 = vpop.permute.xlu0 %718  ;;  %v721_v62 = vpop.permute.xlu1 %720 }
 0x242   :  { %3473 = vmatprep.mubr.msk.f32.mxu0 %vm4213_vm0, %v4214_v4 }
 0x245   :  { %3474 = vmatmul.mubr.msk.f32.gmra.mrb[10].mxu0 %vm254_vm3, %v4345_v36  ;;  %v723_v63 = vpop.permute.xlu0 %722  ;;  %v965_v0 = vpop.permute.xlu1 %964 }
 0x246   :  { %3496 = vmatpush3.xpose.msk.msra.mxu0 %vm254_vm3, %v493_v47  ;;  %3497 = vmatprep.mubr.msk.f32.mxu0 %vm4213_vm0, %v4214_v4 }
 0x247   :  { %3859 = vmatprep.subr.bf16.mxu0 %v4212_v2 }
 0x249   :  { %3498 = vmatmul.mubr.msk.f32.vlgmr.msra.gmra.mrb[12].mxu0 %vm254_vm3, %v483_v49  ;;  %v955_v1 = vpop.permute.xlu0 %954  ;;  %v957_v3 = vpop.permute.xlu1 %956 }
 0x24a   :  { %3862 = vmatpush3.bf16.xpose.msk.msra.mxu0 %vm4373_vm4, %v3860_v54  ;;  %3500 = vmatprep.mubr.msk.f32.mxu0 %vm4213_vm0, %v4214_v4 }
 0x24b   :  { %3525 = vmatprep.subr.mxu0 %v4214_v4 }
 0x24d   :  { %3501 = vmatmul.mubr.msk.f32.gmra.mrb[14].mxu0 %vm254_vm3, %v485_v55  ;;  %v959_v5 = vpop.permute.xlu0 %958 }
 0x24e   :  { %3503 = vmatprep.mubr.msk.f32.mxu0 %vm4213_vm0, %v4214_v4 }
 0x251   :  { %3504 = vmatmul.mubr.msk.f32.gmra.mrb[16].mxu0 %vm254_vm3, %v487_v53 }
 0x252   :  { %3526 = vmatpush3.xpose.msk.msra.mxu0 %vm254_vm3, %v729_v57  ;;  %3527 = vmatprep.mubr.msk.f32.mxu0 %vm4213_vm0, %v4214_v4 }
 0x253   :  { %3866 = vmatprep.subr.bf16.mxu0 %v4212_v2 }
 0x255   :  { %3528 = vmatmul.mubr.msk.f32.vlgmr.msra.gmra.mrb[18].mxu0 %vm254_vm3, %v719_v61 }
 0x256   :  { %3869 = vmatpush3.bf16.xpose.msk.msra.mxu0 %vm4373_vm4, %v3867_v60  ;;  %3530 = vmatprep.mubr.msk.f32.mxu0 %vm4213_vm0, %v4214_v4 }
 0x257   :  { %3555 = vmatprep.subr.mxu0 %v4214_v4 }
 0x259   :  { %3531 = vmatmul.mubr.msk.f32.gmra.mrb[20].mxu0 %vm254_vm3, %v721_v62 }
 0x25a   :  { %3533 = vmatprep.mubr.msk.f32.mxu0 %vm4213_vm0, %v4214_v4 }
 0x25d   :  { %3534 = vmatmul.mubr.msk.f32.gmra.mrb[22].mxu0 %vm254_vm3, %v723_v63 }
 0x25e   :  { %3556 = vmatpush3.xpose.msk.msra.mxu0 %vm254_vm3, %v965_v0  ;;  %3557 = vmatprep.mubr.msk.f32.mxu0 %vm4213_vm0, %v4214_v4 }
 0x25f   :  { %3870 = vmatprep.subr.bf16.mxu0 %v4212_v2 }
 0x261   :  { %3558 = vmatmul.mubr.msk.f32.vlgmr.msra.gmra.mrb[24].mxu0 %vm254_vm3, %v955_v1 }
 0x262   :  { %3560 = vmatprep.mubr.msk.f32.mxu0 %vm4213_vm0, %v4214_v4 }
 0x265   :  { %3561 = vmatmul.mubr.msk.f32.gmra.mrb[26].mxu0 %vm254_vm3, %v957_v3 }
 0x266   :  { %3563 = vmatprep.mubr.msk.f32.mxu0 %vm4213_vm0, %v4214_v4 }
 0x269   :  { %3564 = vmatmul.mubr.msk.f32.gmra.mrb[28].mxu0 %vm254_vm3, %v959_v5 }
 0x26a   :  { %3572 = vmatprep.mubr.msk.f32.mxu0 %vm4213_vm0, %v4214_v4 }
 0x310   :  { %v333_v7 = vpop.f32.mrb[6].mxu0 }
 0x311   :  { %v4437_v8 = vadd.f32 %v333_v7, %v21_v6  ;;  %v3469_v9 = vpop.f32.mrb[7].mxu0 }
 0x313   :  { %v348_v11 = vsel %vm347_vm5, %v4437_v8, -inf }
 0x314   :  { %v338_v12 = vpop.f32.mrb[8].mxu0  ;;  %349 = vmax.xlane.f32.xlu1 %v348_v11 }
 0x315   :  { %v4444_v13 = vadd.f32 %v338_v12, %v22_v10  ;;  %v3472_v14 = vpop.f32.mrb[9].mxu0 }
 0x317   :  { %v351_v16 = vsel %vm347_vm5, %v4444_v13, -inf }
 0x318   :  { %v343_v18 = vpop.f32.mrb[10].mxu0  ;;  %352 = vmax.xlane.f32.xlu0 %v351_v16 }
 0x319   :  { %v4451_v19 = vadd.f32 %v343_v18, %v23_v15  ;;  %v3475_v20 = vpop.f32.mrb[11].mxu0 }
 0x31b   :  { %v355_v22 = vsel %vm354_vm6, %v4451_v19, -inf }
 0x31c   :  { %v572_v23 = vpop.f32.mrb[12].mxu0  ;;  %356 = vmax.xlane.f32.xlu0 %v355_v22 }
 0x31d   :  { %v4455_v24 = vadd.f32 %v572_v23, %v21_v6  ;;  %v3499_v26 = vpop.f32.mrb[13].mxu0 }
 0x31f   :  { %v586_v27 = vsel %vm347_vm5, %v4455_v24, -inf }
 0x320   :  { %v577_v28 = vpop.f32.mrb[14].mxu0  ;;  %587 = vmax.xlane.f32.xlu1 %v586_v27 }
 0x321   :  { %v4459_v29 = vadd.f32 %v577_v28, %v22_v10  ;;  %v3502_v30 = vpop.f32.mrb[15].mxu0 }
 0x323   :  { %v589_v31 = vsel %vm347_vm5, %v4459_v29, -inf }
 0x324   :  { %v582_v32 = vpop.f32.mrb[16].mxu0  ;;  %590 = vmax.xlane.f32.xlu0 %v589_v31 }
 0x325   :  { %v4463_v33 = vadd.f32 %v582_v32, %v23_v15  ;;  %v3505_v35 = vpop.f32.mrb[17].mxu0 }
 0x327   :  { %v592_v37 = vsel %vm354_vm6, %v4463_v33, -inf }
 0x328   :  { %v808_v38 = vpop.f32.mrb[18].mxu0  ;;  %593 = vmax.xlane.f32.xlu1 %v592_v37 }
 0x329   :  { %v4467_v39 = vadd.f32 %v808_v38, %v21_v6  ;;  %v3529_v40 = vpop.f32.mrb[19].mxu0 }
 0x32b   :  { %v822_v42 = vsel %vm347_vm5, %v4467_v39, -inf }
 0x32c   :  { %v813_v43 = vpop.f32.mrb[20].mxu0  ;;  %823 = vmax.xlane.f32.xlu0 %v822_v42 }
 0x32d   :  { %v4471_v44 = vadd.f32 %v813_v43, %v22_v10  ;;  %v3532_v45 = vpop.f32.mrb[21].mxu0 }
 0x32f   :  { %v825_v46 = vsel %vm347_vm5, %v4471_v44, -inf }
 0x330   :  { %v818_v47 = vpop.f32.mrb[22].mxu0  ;;  %826 = vmax.xlane.f32.xlu1 %v825_v46 }
 0x331   :  { %v4475_v48 = vadd.f32 %v818_v47, %v23_v15  ;;  %v3535_v49 = vpop.f32.mrb[23].mxu0 }
 0x333   :  { %v828_v50 = vsel %vm354_vm6, %v4475_v48, -inf }
 0x334   :  { %v1044_v51 = vpop.f32.mrb[24].mxu0  ;;  %829 = vmax.xlane.f32.xlu0 %v828_v50 }
 0x335   :  { %v4479_v52 = vadd.f32 %v1044_v51, %v21_v6  ;;  %v3559_v53 = vpop.f32.mrb[25].mxu0 }
 0x337   :  { %v1058_v54 = vsel %vm347_vm5, %v4479_v52, -inf }
 0x338   :  { %v1049_v55 = vpop.f32.mrb[26].mxu0  ;;  %1059 = vmax.xlane.f32.xlu1 %v1058_v54 }
 0x339   :  { %v4483_v56 = vadd.f32 %v1049_v55, %v22_v10  ;;  %v3562_v57 = vpop.f32.mrb[27].mxu0 }
 0x33b   :  { %v1061_v58 = vsel %vm347_vm5, %v4483_v56, -inf }
 0x33c   :  { %v1054_v59 = vpop.f32.mrb[28].mxu0  ;;  %1062 = vmax.xlane.f32.xlu0 %v1061_v58 }
 0x33d   :  { %v4487_v60 = vadd.f32 %v1054_v59, %v23_v15  ;;  %v3565_v61 = vpop.f32.mrb[29].mxu0 }
 0x33f   :  { %v1064_v62 = vsel %vm354_vm6, %v4487_v60, -inf }
 0x340   :  { %1065 = vmax.xlane.f32.xlu1 %v1064_v62 }
 0x351   :  { %3998 = vrot.lane.b32.xlu1 %v4339_v34, %s4222_s7 }
 0x352   :  { %386 = vrot.lane.b32.xlu0 %v4345_v36, %s4222_s7 }
 0x356   :  { %4003 = vrot.lane.b32.xlu0 %v4339_v34, %s4223_s8 }
 0x3a1   :  { %v350_v63 = vpop.xlane.xlu1 %349 }
 0x3a2   :  { %v358_v0 = vsub.f32 %v4437_v8, %v350_v63 }
 0x3a4   :  { %v361_v1 = vmul.f32 1.442695, %v358_v0 }
 0x3a5   :  { %v353_v3 = vpop.xlane.xlu0 %352 }
 0x3a6   :  { %4057 = vpow2.f32 %v361_v1  ;;  %v359_v5 = vsub.f32 %v4444_v13, %v353_v3 }
 0x3a8   :  { %v363_v6 = vmul.f32 1.442695, %v359_v5 }
 0x3a9   :  { %v357_v7 = vpop.xlane.xlu0 %356 }
 0x3aa   :  { %4059 = vpow2.f32 %v363_v6  ;;  %v360_v9 = vsub.f32 %v4451_v19, %v357_v7 }
 0x3ac   :  { %v365_v10 = vmul.f32 1.442695, %v360_v9 }
 0x3ad   :  { %v588_v11 = vpop.xlane.xlu1 %587 }
 0x3ae   :  { %4061 = vpow2.f32 %v365_v10  ;;  %v595_v12 = vsub.f32 %v4455_v24, %v588_v11 }
 0x3b0   :  { %v4501_v14 = vpop.eup %4057  ;;  %v598_v15 = vmul.f32 1.442695, %v595_v12 }
 0x3b1   :  { %v591_v16 = vpop.xlane.xlu0 %590  ;;  %v367_v8 = vsel %vm347_vm5, %v4501_v14, 0.0 }
 0x3b2   :  { %4063 = vpow2.f32 %v598_v15  ;;  %v596_v13 = vsub.f32 %v4459_v29, %v591_v16  ;;  %368 = vadd.xlane.f32.xlu0 %v367_v8 }
 0x3b4   :  { %v4506_v18 = vpop.eup %4059  ;;  %v600_v20 = vmul.f32 1.442695, %v596_v13 }
 0x3b5   :  { %v594_v19 = vpop.xlane.xlu1 %593  ;;  %v370_v22 = vsel %vm347_vm5, %v4506_v18, 0.0 }
 0x3b6   :  { %4065 = vpow2.f32 %v600_v20  ;;  %v597_v23 = vsub.f32 %v4463_v33, %v594_v19  ;;  %371 = vadd.xlane.f32.xlu1 %v370_v22 }
 0x3b8   :  { %v4511_v24 = vpop.eup %4061  ;;  %v602_v26 = vmul.f32 1.442695, %v597_v23 }
 0x3b9   :  { %v824_v27 = vpop.xlane.xlu0 %823  ;;  %v373_v28 = vsel %vm354_vm6, %v4511_v24, 0.0 }
 0x3ba   :  { %4067 = vpow2.f32 %v602_v26  ;;  %v831_v29 = vsub.f32 %v4467_v39, %v824_v27  ;;  %374 = vadd.xlane.f32.xlu0 %v373_v28 }
 0x3bc   :  { %v4516_v30 = vpop.eup %4063  ;;  %v834_v31 = vmul.f32 1.442695, %v831_v29 }
 0x3bd   :  { %v827_v32 = vpop.xlane.xlu1 %826  ;;  %v604_v35 = vsel %vm347_vm5, %v4516_v30, 0.0 }
 0x3be   :  { %4069 = vpow2.f32 %v834_v31  ;;  %v832_v33 = vsub.f32 %v4471_v44, %v827_v32  ;;  %605 = vadd.xlane.f32.xlu1 %v604_v35 }
 0x3c0   :  { %v4521_v37 = vpop.eup %4065  ;;  %v836_v38 = vmul.f32 1.442695, %v832_v33 }
 0x3c1   :  { %v830_v40 = vpop.xlane.xlu0 %829  ;;  %v607_v42 = vsel %vm347_vm5, %v4521_v37, 0.0 }
 0x3c2   :  { %4071 = vpow2.f32 %v836_v38  ;;  %v833_v39 = vsub.f32 %v4475_v48, %v830_v40  ;;  %608 = vadd.xlane.f32.xlu0 %v607_v42 }
 0x3c4   :  { %v4526_v43 = vpop.eup %4067  ;;  %v838_v45 = vmul.f32 1.442695, %v833_v39 }
 0x3c5   :  { %v1060_v46 = vpop.xlane.xlu1 %1059  ;;  %v610_v47 = vsel %vm354_vm6, %v4526_v43, 0.0 }
 0x3c6   :  { %4073 = vpow2.f32 %v838_v45  ;;  %v1067_v44 = vsub.f32 %v4479_v52, %v1060_v46  ;;  %611 = vadd.xlane.f32.xlu0 %v610_v47 }
 0x3c8   :  { %v4531_v49 = vpop.eup %4069  ;;  %v1070_v50 = vmul.f32 1.442695, %v1067_v44 }
 0x3c9   :  { %v1063_v51 = vpop.xlane.xlu0 %1062  ;;  %v840_v53 = vsel %vm347_vm5, %v4531_v49, 0.0 }
 0x3ca   :  { %4075 = vpow2.f32 %v1070_v50  ;;  %v1068_v48 = vsub.f32 %v4483_v56, %v1063_v51  ;;  %841 = vadd.xlane.f32.xlu0 %v840_v53 }
 0x3cc   :  { %v4536_v54 = vpop.eup %4071  ;;  %v1072_v55 = vmul.f32 1.442695, %v1068_v48 }
 0x3cd   :  { %v1066_v57 = vpop.xlane.xlu1 %1065  ;;  %v843_v58 = vsel %vm347_vm5, %v4536_v54, 0.0  ;;  %v387_v6 = vpop.permute.xlu0 %386 }
 0x3ce   :  { %4077 = vpow2.f32 %v1072_v55  ;;  %844 = vadd.xlane.f32.xlu1 %v843_v58  ;;  %v1069_v7 = vsub.f32 %v4487_v60, %v1066_v57 }
 0x3d0   :  { %v4540_v52 = vpop.eup %4073  ;;  %v1074_v9 = vmul.f32 1.442695, %v1069_v7 }
 0x3d1   :  { %v3999_v59 = vpop.permute.xlu1 %3998  ;;  %v846_v61 = vsel %vm354_vm6, %v4540_v52, 0.0  ;;  %v4004_v12 = vpop.permute.xlu0 %4003 }
 0x3d2   :  { %v4001_v62 = vunpack.i.h.bf16 %v3999_v59  ;;  %847 = vadd.xlane.f32.xlu0 %v846_v61  ;;  %v4000_v63 = vunpack.i.l.bf16 %v3999_v59  ;;  %4079 = vpow2.f32 %v1074_v9  ;;  %v4005_v13 = vunpack.i.l.bf16 %v4004_v12 }
 0x3d4   :  { %v4544_v56 = vpop.eup %4075  ;;  %v3850_v0 = vpack.c.bf16 %v4001_v62, %v4000_v63 }
 0x3d5   :  { %v1076_v1 = vsel %vm347_vm5, %v4544_v56, 0.0 }
 0x3d6   :  { %1077 = vadd.xlane.f32.xlu1 %v1076_v1  ;;  %3851 = vmatpush3.bf16.msra.mxu1 %v3850_v0 }
 0x3d7   :  { %3480 = vmatprep.subr.mxu1 %v4214_v4 }
 0x3d8   :  { %v4548_v3 = vpop.eup %4077 }
 0x3d9   :  { %v1079_v5 = vsel %vm347_vm5, %v4548_v3, 0.0 }
 0x3da   :  { %1080 = vadd.xlane.f32.xlu1 %v1079_v5  ;;  %3481 = vmatpush3.msk.msra.mxu1 %vm399_vm7, %v387_v6 }
 0x3db   :  { %3856 = vmatprep.subr.bf16.mxu1 %v4212_v2 }
 0x3dc   :  { %v4566_v10 = vpop.eup %4079 }
 0x3dd   :  { %v1082_v11 = vsel %vm354_vm6, %v4566_v10, 0.0 }
 0x3e8   :  { %4008 = vrot.lane.b32.xlu0 %v4339_v34, %s4224_s9 }
 0x3eb   :  { %623 = vrot.lane.b32.xlu1 %v4345_v36, %s4223_s8 }
 0x3ec   :  { %859 = vrot.lane.b32.xlu0 %v4345_v36, %s4224_s9 }
 0x3f0   :  { %4013 = vrot.lane.b32.xlu0 %v4339_v34, %s4225_s10  ;;  %v4006_v34 = vunpack.i.h.bf16 %v4004_v12  ;;  %v127_v12 = vld [vmem:[%s5238_s3 + $0x38] sm:$0xff] }
 0x3f2   :  { %v3857_v20 = vpack.c.bf16 %v4006_v34, %v4005_v13  ;;  %v130_v34 = vld [vmem:[%s5238_s3 + $0x50] sm:$0xff] }
 0x3f4   :  { %1095 = vrot.lane.b32.xlu0 %v4345_v36, %s4225_s10 }
 0x40f   :  { %1083 = vadd.xlane.f32.xlu1 %v1082_v11 }
 0x43f   :  { %v369_v15 = vpop.xlane.xlu0 %368 }
 0x440   :  { %4081 = vrcp.f32 %v369_v15  ;;  %v128_v15 = vld [vmem:[%s5238_s3 + $0x40] sm:$0xff] }
 0x443   :  { %v372_v16 = vpop.xlane.xlu1 %371 }
 0x444   :  { %4083 = vrcp.f32 %v372_v16 }
 0x447   :  { %v375_v8 = vpop.xlane.xlu0 %374 }
 0x448   :  { %4085 = vrcp.f32 %v375_v8  ;;  %v129_v8 = vld [vmem:[%s5238_s3 + $0x48] sm:$0xff] }
 0x44a   :  { %v4082_v36 = vpop.eup %4081 }
 0x44b   :  { %v377_v60 = vmul.f32 %v4082_v36, %v4501_v14  ;;  %v606_v28 = vpop.xlane.xlu1 %605  ;;  %v3877_v36 = vpack.c.bf16 %v130_v34, %v129_v8 }
 0x44c   :  { %4087 = vrcp.f32 %v606_v28 }
 0x44d   :  { %3483 = vmatmul.mubr.msk.f32.vlgmr.msra.gmra.mrb[6].mxu1 %vm347_vm5, %v377_v60 }
 0x44e   :  { %v4084_v19 = vpop.eup %4083  ;;  %3858 = vmatpush3.bf16.msra.mxu1 %v3857_v20  ;;  %3485 = vmatprep.mubr.msk.f32.mxu1 %vm4213_vm0, %v4214_v4 }
 0x44f   :  { %v609_v22 = vpop.xlane.xlu0 %608  ;;  %v379_v23 = vmul.f32 %v4084_v19, %v4506_v18  ;;  %3510 = vmatprep.subr.mxu1 %v4214_v4 }
 0x450   :  { %4089 = vrcp.f32 %v609_v22 }
 0x451   :  { %3486 = vmatmul.mubr.msk.f32.gmra.mrb[8].mxu1 %vm347_vm5, %v379_v23 }
 0x452   :  { %v4086_v26 = vpop.eup %4085  ;;  %3488 = vmatprep.mubr.msk.f32.mxu1 %vm4213_vm0, %v4214_v4 }
 0x453   :  { %v381_v14 = vmul.f32 %v4086_v26, %v4511_v24  ;;  %v612_v27 = vpop.xlane.xlu0 %611 }
 0x454   :  { %4091 = vrcp.f32 %v612_v27 }
 0x455   :  { %3489 = vmatmul.mubr.msk.f32.gmra.mrb[10].mxu1 %vm347_vm5, %v381_v14 }
 0x456   :  { %3512 = vmatprep.mubr.msk.f32.mxu1 %vm4213_vm0, %v4214_v4  ;;  %v4088_v40 = vpop.eup %4087 }
 0x457   :  { %v842_v29 = vpop.xlane.xlu0 %841  ;;  %v614_v39 = vmul.f32 %v4088_v40, %v4516_v30 }
 0x45a   :  { %v4090_v47 = vpop.eup %4089 }
 0x45b   :  { %v845_v18 = vpop.xlane.xlu1 %844  ;;  %v616_v30 = vmul.f32 %v4090_v47, %v4521_v37 }
 0x45e   :  { %v4092_v48 = vpop.eup %4091 }
 0x45f   :  { %v848_v31 = vpop.xlane.xlu0 %847  ;;  %v618_v59 = vmul.f32 %v4092_v48, %v4526_v43 }
 0x463   :  { %v4009_v32 = vpop.permute.xlu0 %4008  ;;  %v1078_v35 = vpop.xlane.xlu1 %1077 }
 0x464   :  { %4093 = vrcp.f32 %v1078_v35  ;;  %v4011_v24 = vunpack.i.h.bf16 %v4009_v32  ;;  %v4010_v42 = vunpack.i.l.bf16 %v4009_v32 }
 0x465   :  { %4095 = vrcp.f32 %v842_v29 }
 0x466   :  { %v3864_v44 = vpack.c.bf16 %v4011_v24, %v4010_v42  ;;  %4097 = vrcp.f32 %v845_v18 }
 0x467   :  { %v860_v33 = vpop.permute.xlu0 %859  ;;  %v1081_v38 = vpop.xlane.xlu1 %1080  ;;  %4099 = vrcp.f32 %v848_v31 }
 0x468   :  { %4101 = vrcp.f32 %v1081_v38 }
 0x46b   :  { %v4014_v45 = vpop.permute.xlu0 %4013  ;;  %v624_v46 = vpop.permute.xlu1 %623 }
 0x46c   :  { %v4016_v50 = vunpack.i.h.bf16 %v4014_v45  ;;  %v4015_v51 = vunpack.i.l.bf16 %v4014_v45  ;;  %3511 = vmatpush3.msk.msra.mxu1 %vm399_vm7, %v624_v46 }
 0x46d   :  { %3513 = vmatmul.mubr.msk.f32.vlgmr.msra.gmra.mrb[12].mxu1 %vm347_vm5, %v614_v39  ;;  %3863 = vmatprep.subr.bf16.mxu1 %v4212_v2 }
 0x46e   :  { %v3871_v53 = vpack.c.bf16 %v4016_v50, %v4015_v51  ;;  %3865 = vmatpush3.bf16.msra.mxu1 %v3864_v44  ;;  %3515 = vmatprep.mubr.msk.f32.mxu1 %vm4213_vm0, %v4214_v4  ;;  %v4094_v55 = vpop.eup %4093 }
 0x46f   :  { %3540 = vmatprep.subr.mxu1 %v4214_v4  ;;  %v1086_v57 = vmul.f32 %v4094_v55, %v4544_v56  ;;  %v1096_v58 = vpop.permute.xlu0 %1095  ;;  %v4096_v37 = vpop.eup %4095 }
 0x470   :  { %3872 = vmatpush3.bf16.msra.mxu0 %v3871_v53  ;;  %v850_v61 = vmul.f32 %v4096_v37, %v4531_v49  ;;  %v4098_v43 = vpop.eup %4097 }
 0x471   :  { %3516 = vmatmul.mubr.msk.f32.gmra.mrb[14].mxu1 %vm347_vm5, %v616_v30  ;;  %3570 = vmatprep.subr.mxu0 %v4214_v4  ;;  %v852_v62 = vmul.f32 %v4098_v43, %v4536_v54  ;;  %v4100_v63 = vpop.eup %4099 }
 0x472   :  { %3541 = vmatpush3.msk.msra.mxu1 %vm399_vm7, %v860_v33  ;;  %3518 = vmatprep.mubr.msk.f32.mxu1 %vm4213_vm0, %v4214_v4  ;;  %v854_v49 = vmul.f32 %v4100_v63, %v4540_v52  ;;  %v4102_v56 = vpop.eup %4101 }
 0x473   :  { %3955 = vmatprep.subr.bf16.mxu1 %v4212_v2  ;;  %v1088_v54 = vmul.f32 %v4102_v56, %v4548_v3 }
 0x474   :  { %3571 = vmatpush3.msk.msra.mxu0 %vm399_vm7, %v1096_v58 }
 0x475   :  { %3519 = vmatmul.mubr.msk.f32.gmra.mrb[16].mxu1 %vm347_vm5, %v618_v59  ;;  %3573 = vmatmul.mubr.msk.f32.vlgmr.msra.gmra.mrb[30].mxu0 %vm347_vm5, %v1086_v57 }
 0x476   :  { %3542 = vmatprep.mubr.msk.f32.mxu1 %vm4213_vm0, %v4214_v4  ;;  %3873 = vmatprep.subr.bf16.mxu0 %v4212_v2 }
 0x477   :  { %3589 = vmatprep.mubr.msk.f32.mxu0 %vm4213_vm0, %v4214_v4 }
 0x479   :  { %3543 = vmatmul.mubr.msk.f32.vlgmr.msra.gmra.mrb[18].mxu1 %vm347_vm5, %v850_v61  ;;  %v3187_v61 = vld [vmem:[%s5239_s4 + $0x1] ss:$0 sm:$0xff] }
 0x47a   :  { %3957 = vmatpush3.bf16.msra.mxu1 %v3871_v53  ;;  %3545 = vmatprep.mubr.msk.f32.mxu1 %vm4213_vm0, %v4214_v4 }
 0x47b   :  { %3956 = vmatprep.subr.mxu1 %v4214_v4 }
 0x47d   :  { %3546 = vmatmul.mubr.msk.f32.gmra.mrb[20].mxu1 %vm347_vm5, %v852_v62 }
 0x47e   :  { %3958 = vmatpush3.msk.msra.mxu1 %vm399_vm7, %v1096_v58  ;;  %3548 = vmatprep.mubr.msk.f32.mxu1 %vm4213_vm0, %v4214_v4 }
 0x47f   :  { %3879 = vmatprep.subr.bf16.mxu1 %v4212_v2 }
 0x481   :  { %3549 = vmatmul.mubr.msk.f32.gmra.mrb[22].mxu1 %vm347_vm5, %v854_v49 }
 0x482   :  { %3575 = vmatprep.mubr.msk.f32.mxu1 %vm4213_vm0, %v4214_v4 }
 0x485   :  { %3576 = vmatmul.mubr.msk.f32.vlgmr.msra.gmra.mrb[24].mxu1 %vm347_vm5, %v1088_v54 }
 0x486   :  { %3578 = vmatprep.mubr.msk.f32.mxu1 %vm4213_vm0, %v4214_v4 }
 0x49c   :  { %v1084_v0 = vpop.xlane.xlu1 %1083 }
 0x49d   :  { %4103 = vrcp.f32 %v1084_v0 }
 0x4a7   :  { %v4104_v1 = vpop.eup %4103 }
 0x4a8   :  { %v1090_v52 = vmul.f32 %v4104_v1, %v4566_v10  ;;  %v3874_v10 = vpack.c.bf16 %v128_v15, %v127_v12 }
 0x4aa   :  { %3579 = vmatmul.mubr.msk.f32.gmra.mrb[26].mxu1 %vm347_vm5, %v1090_v52  ;;  %3875 = vmatpush3.bf16.msra.mxu0 %v3874_v10 }
 0x4ab   :  { %3606 = vmatprep.mubr.msk.f32.mxu1 %vm4213_vm0, %v4214_v4  ;;  %3876 = vmatprep.subr.bf16.mxu0 %v4212_v2 }
 0x4ae   :  { %3878 = vmatpush3.bf16.msra.mxu0 %v3877_v36 }
 0x4af   :  { %3885 = vmatprep.subr.bf16.mxu0 %v4212_v2 }
 0x520   :  { %v468_v5 = vpop.f32.mrb[6].mxu1 }
 0x521   :  { %v3484_v6 = vpop.f32.mrb[7].mxu1 }
 0x524   :  { %v473_v7 = vpop.f32.mrb[8].mxu1 }
 0x525   :  { %v3487_v9 = vpop.f32.mrb[9].mxu1 }
 0x528   :  { %v478_v3 = vpop.f32.mrb[10].mxu1 }
 0x529   :  { %v3490_v11 = vpop.f32.mrb[11].mxu1 }
 0x540   :  { %v704_v16 = vpop.f32.mrb[12].mxu1 }
 0x541   :  { %1193 = vrot.lane.b32.xlu0 %v704_v16, %s4226_s18  ;;  %v3514_v13 = vpop.f32.mrb[13].mxu1 }
 0x544   :  { %v709_v60 = vpop.f32.mrb[14].mxu1 }
 0x545   :  { %1195 = vrot.lane.b32.xlu0 %v709_v60, %s4226_s18  ;;  %v3517_v20 = vpop.f32.mrb[15].mxu1  ;;  %v132_v60 = vld [vmem:[%s5238_s3 + $0x60] sm:$0xff] }
 0x548   :  { %v714_v19 = vpop.f32.mrb[16].mxu1  ;;  %v1176_v22 = vpop.f32.mrb[30].mxu0 }
 0x549   :  { %v3520_v23 = vpop.f32.mrb[17].mxu1  ;;  %v3574_v26 = vpop.f32.mrb[31].mxu0 }
 0x54c   :  { %v940_v14 = vpop.f32.mrb[18].mxu1 }
 0x54d   :  { %1205 = vrot.lane.b32.xlu0 %v940_v14, %s4227_s2  ;;  %v3544_v27 = vpop.f32.mrb[19].mxu1 }
 0x550   :  { %v945_v28 = vpop.f32.mrb[20].mxu1 }
 0x551   :  { %1217 = vrot.lane.b32.xlu0 %v1176_v22, %s4228_s26  ;;  %1207 = vrot.lane.b32.xlu1 %v945_v28, %s4227_s2  ;;  %v3547_v29 = vpop.f32.mrb[21].mxu1  ;;  %v134_v22 = vld [vmem:[%s5238_s3 + $0x70] sm:$0xff] }
 0x554   :  { %v950_v18 = vpop.f32.mrb[22].mxu1 }
 0x555   :  { %v3550_v31 = vpop.f32.mrb[23].mxu1 }
 0x558   :  { %v1181_v32 = vpop.f32.mrb[24].mxu1 }
 0x559   :  { %1219 = vrot.lane.b32.xlu0 %v1181_v32, %s4228_s26  ;;  %v3577_v35 = vpop.f32.mrb[25].mxu1 }
 0x55d   :  { %1197 = vrot.lane.b32.xlu0 %v714_v19, %s4226_s18  ;;  %v133_v19 = vld [vmem:[%s5238_s3 + $0x68] sm:$0xff] }
 0x55e   :  { %v3883_v23 = vpack.c.bf16 %v134_v22, %v133_v19 }
 0x561   :  { %1209 = vrot.lane.b32.xlu0 %v950_v18, %s4227_s2 }
 0x57d   :  { %v1186_v33 = vpop.f32.mrb[26].mxu1 }
 0x57e   :  { %1221 = vrot.lane.b32.xlu0 %v1186_v33, %s4228_s26  ;;  %v3580_v38 = vpop.f32.mrb[27].mxu1 }
 0x5b3   :  { %v1194_v40 = vpop.permute.xlu0 %1193 }
 0x5b4   :  { %v1226_v39 = vsel %vm254_vm3, %v468_v5, %v1194_v40 }
 0x5b7   :  { %v1196_v24 = vpop.permute.xlu0 %1195 }
 0x5b8   :  { %v1227_v50 = vsel %vm254_vm3, %v473_v7, %v1196_v24  ;;  %v3191_v24 = vld [vmem:[%s5239_s4 + $0x2] ss:$0 sm:$0xff] }
 0x5bf   :  { %v1206_v42 = vpop.permute.xlu0 %1205 }
 0x5c0   :  { %v1230_v45 = vsel %vm1229_vm8, %v1226_v39, %v1206_v42  ;;  %v3192_v39 = vld [vmem:[%s5239_s4 + $0x3] ss:$0 sm:$0xff] }
 0x5c3   :  { %v1218_v46 = vpop.permute.xlu0 %1217  ;;  %v1208_v44 = vpop.permute.xlu1 %1207 }
 0x5c4   :  { %v1233_v47 = vsel %vm33_vm1, %v1230_v45, %v1218_v46  ;;  %v1231_v51 = vsel %vm1229_vm8, %v1227_v50, %v1208_v44 }
 0x5c5   :  { %3590 = vmatmul.mubr.msk.f32.vlgmr.msra.gmra.mrb[32].mxu0 %vm155_vm2, %v1233_v47 }
 0x5c6   :  { %3592 = vmatprep.mubr.msk.f32.mxu0 %vm4213_vm0, %v4214_v4 }
 0x5cb   :  { %v1220_v53 = vpop.permute.xlu0 %1219 }
 0x5cc   :  { %v1234_v48 = vsel %vm33_vm1, %v1231_v51, %v1220_v53 }
 0x5cd   :  { %3593 = vmatmul.mubr.msk.f32.gmra.mrb[34].mxu0 %vm155_vm2, %v1234_v48 }
 0x5ce   :  { %3595 = vmatprep.mubr.msk.f32.mxu0 %vm4213_vm0, %v4214_v4 }
 0x5cf   :  { %v1198_v30 = vpop.permute.xlu0 %1197 }
 0x5d0   :  { %v1228_v57 = vsel %vm254_vm3, %v478_v3, %v1198_v30 }
 0x5d3   :  { %v1210_v55 = vpop.permute.xlu0 %1209 }
 0x5d4   :  { %v1232_v58 = vsel %vm1229_vm8, %v1228_v57, %v1210_v55 }
 0x5f0   :  { %v1222_v59 = vpop.permute.xlu0 %1221 }
 0x5f1   :  { %v1235_v37 = vsel %vm33_vm1, %v1232_v58, %v1222_v59 }
 0x5f2   :  { %3596 = vmatmul.mubr.msk.f32.gmra.mrb[36].mxu0 %vm155_vm2, %v1235_v37  ;;  %v135_v37 = vld [vmem:[%s5238_s3 + $0x78] sm:$0xff] }
 0x5f3   :  { %3631 = vmatprep.mubr.msk.f32.mxu0 %vm4213_vm0, %v4214_v4 }
 0x698   :  { %v1315_v43 = vpop.f32.mrb[32].mxu0 }
 0x699   :  { %v1316_v62 = vadd.f32 %v3187_v61, %v1315_v43  ;;  %v3591_v63 = vpop.f32.mrb[33].mxu0 }
 0x69a   :  { %v138_v63 = vld [vmem:[%s5238_s3 + $0x90] sm:$0xff] }
 0x69b   :  { %v1329_v49 = vadd.f32 %v1316_v62, %v4312_v17  ;;  %v137_v62 = vld [vmem:[%s5238_s3 + $0x88] sm:$0xff] }
 0x69d   :  { %v1332_v56 = vsel %vm155_vm2, %v1329_v49, 0.0 }
 0x69e   :  { %1333 = vadd.xlane.f32.xlu1 %v1332_v56  ;;  %v139_v56 = vld [vmem:[%s5238_s3 + $0x98] sm:$0xff] }
 0x6a0   :  { %v1320_v54 = vpop.f32.mrb[34].mxu0 }
 0x6a1   :  { %v1321_v0 = vadd.f32 %v3187_v61, %v1320_v54  ;;  %v3594_v1 = vpop.f32.mrb[35].mxu0  ;;  %v140_v54 = vld [vmem:[%s5238_s3 + $0xa0] sm:$0xff] }
 0x6a2   :  { %v141_v1 = vld [vmem:[%s5238_s3 + $0xa8] sm:$0xff] }
 0x6a3   :  { %v1330_v52 = vadd.f32 %v1321_v0, %v4321_v21  ;;  %v3892_v0 = vpack.c.bf16 %v140_v54, %v139_v56  ;;  %v1648_v56 = vld [vmem:[%s5238_s3 + $0xd0] sm:$0xff] }
 0x6a5   :  { %v1335_v5 = vsel %vm155_vm2, %v1330_v52, 0.0 }
 0x6a6   :  { %1336 = vadd.xlane.f32.xlu0 %v1335_v5 }
 0x6c5   :  { %v1325_v6 = vpop.f32.mrb[36].mxu0 }
 0x6c6   :  { %v1326_v7 = vadd.f32 %v3187_v61, %v1325_v6  ;;  %v3597_v9 = vpop.f32.mrb[37].mxu0  ;;  %v136_v61 = vld [vmem:[%s5238_s3 + $0x80] sm:$0xff] }
 0x6c7   :  { %v3886_v43 = vpack.c.bf16 %v136_v61, %v135_v37  ;;  %v3193_v6 = vld [vmem:[%s5239_s4 + $0x4] ss:$0 sm:$0xff] }
 0x6c8   :  { %v1331_v3 = vadd.f32 %v1326_v7, %v4330_v25  ;;  %v131_v25 = vld [vmem:[%s5238_s3 + $0x58] sm:$0xff] }
 0x6c9   :  { %v3880_v20 = vpack.c.bf16 %v132_v60, %v131_v25  ;;  %3887 = vmatpush3.bf16.msra.mxu0 %v3886_v43 }
 0x6ca   :  { %v1339_v11 = vsel %vm1338_vm9, %v1331_v3, 0.0  ;;  %3888 = vmatprep.subr.bf16.mxu0 %v4212_v2 }
 0x6cb   :  { %1340 = vadd.xlane.f32.xlu0 %v1339_v11  ;;  %3881 = vmatpush3.bf16.msra.mxu1 %v3880_v20 }
 0x6cc   :  { %3882 = vmatprep.subr.bf16.mxu1 %v4212_v2 }
 0x6cf   :  { %3884 = vmatpush3.bf16.msra.mxu1 %v3883_v23 }
 0x6d0   :  { %3897 = vmatprep.subr.bf16.mxu1 %v4212_v2 }
 0x72b   :  { %v1334_v17 = vpop.xlane.xlu1 %1333 }
 0x72c   :  { %v1343_v12 = vmul.f32 0.03125, %v1334_v17 }
 0x72e   :  { %v1346_v15 = vsub.f32 %v1329_v49, %v1343_v12  ;;  %v3889_v49 = vpack.c.bf16 %v138_v63, %v137_v62  ;;  %v1646_v62 = vld [vmem:[%s5238_s3 + $0xc0] sm:$0xff] }
 0x730   :  { %v1349_v10 = vmul.f32 %v1346_v15, %v1346_v15  ;;  %3890 = vmatpush3.bf16.msra.mxu0 %v3889_v49  ;;  %v1647_v49 = vld [vmem:[%s5238_s3 + $0xc8] sm:$0xff] }
 0x731   :  { %3891 = vmatprep.subr.bf16.mxu0 %v4212_v2  ;;  %v3901_v54 = vpack.c.bf16 %v1648_v56, %v1647_v49 }
 0x732   :  { %v1352_v16 = vsel %vm155_vm2, %v1349_v10, 0.0 }
 0x733   :  { %1353 = vadd.xlane.f32.xlu1 %v1352_v16  ;;  %v1337_v21 = vpop.xlane.xlu0 %1336 }
 0x734   :  { %v1344_v8 = vmul.f32 0.03125, %v1337_v21  ;;  %3893 = vmatpush3.bf16.msra.mxu0 %v3892_v0 }
 0x735   :  { %3894 = vmatprep.subr.bf16.mxu0 %v4212_v2 }
 0x736   :  { %v1347_v34 = vsub.f32 %v1330_v52, %v1344_v8  ;;  %v142_v52 = vld [vmem:[%s5238_s3 + $0xb0] sm:$0xff] }
 0x737   :  { %v3895_v5 = vpack.c.bf16 %v142_v52, %v141_v1 }
 0x738   :  { %v1350_v13 = vmul.f32 %v1347_v34, %v1347_v34 }
 0x739   :  { %3896 = vmatpush3.bf16.msra.mxu0 %v3895_v5 }
 0x73a   :  { %v1355_v36 = vsel %vm155_vm2, %v1350_v13, 0.0  ;;  %3907 = vmatprep.subr.bf16.mxu0 %v4212_v2 }
 0x73b   :  { %1356 = vadd.xlane.f32.xlu0 %v1355_v36 }
 0x758   :  { %v1341_v26 = vpop.xlane.xlu0 %1340 }
 0x759   :  { %v1345_v14 = vmul.f32 0.03125, %v1341_v26 }
 0x75b   :  { %v1348_v27 = vsub.f32 %v1331_v3, %v1345_v14 }
 0x75d   :  { %v1351_v28 = vmul.f32 %v1348_v27, %v1348_v27 }
 0x75f   :  { %v1358_v29 = vsel %vm1338_vm9, %v1351_v28, 0.0 }
 0x760   :  { %1359 = vadd.xlane.f32.xlu1 %v1358_v29  ;;  %v3197_v29 = vld [vmem:[%s5239_s4 + $0x5] ss:$0 sm:$0xff] }
 0x7c0   :  { %v1354_v18 = vpop.xlane.xlu1 %1353 }
 0x7c1   :  { %v1361_v31 = vmul.f32 0.03125, %v1354_v18 }
 0x7c3   :  { %v1364_v32 = vadd.f32 1e-05, %v1361_v31 }
 0x7c5   :  { %4105 = vrsqrt.f32 %v1364_v32 }
 0x7c8   :  { %v1357_v35 = vpop.xlane.xlu0 %1356 }
 0x7c9   :  { %v1362_v33 = vmul.f32 0.03125, %v1357_v35 }
 0x7cb   :  { %v1365_v38 = vadd.f32 1e-05, %v1362_v33 }
 0x7cd   :  { %4107 = vrsqrt.f32 %v1365_v38 }
 0x7cf   :  { %v4106_v40 = vpop.eup %4105 }
 0x7d0   :  { %v1370_v42 = vmul.f32 %v4106_v40, %v1346_v15 }
 0x7d2   :  { %v1377_v45 = vmul.f32 %v3191_v24, %v1370_v42 }
 0x7d4   :  { %v4703_v46 = vadd.f32 %v3192_v39, %v1377_v45 }
 0x7d6   :  { %3607 = vmatmul.mubr.msk.f32.vlgmr.msra.gmra.mrb[28].mxu1 %vm155_vm2, %v4703_v46 }
 0x7d7   :  { %v4108_v47 = vpop.eup %4107  ;;  %3609 = vmatprep.mubr.msk.f32.mxu1 %vm4213_vm0, %v4214_v4 }
 0x7d8   :  { %v1371_v44 = vmul.f32 %v4108_v47, %v1347_v34 }
 0x7da   :  { %v1378_v50 = vmul.f32 %v3191_v24, %v1371_v44 }
 0x7dc   :  { %v4709_v51 = vadd.f32 %v3192_v39, %v1378_v50 }
 0x7de   :  { %3610 = vmatmul.mubr.msk.f32.gmra.mrb[30].mxu1 %vm155_vm2, %v4709_v51 }
 0x7df   :  { %3612 = vmatprep.mubr.msk.f32.mxu1 %vm4213_vm0, %v4214_v4 }
 0x7ed   :  { %v1360_v53 = vpop.xlane.xlu1 %1359 }
 0x7ee   :  { %v1363_v48 = vmul.f32 0.03125, %v1360_v53 }
 0x7f0   :  { %v1366_v30 = vadd.f32 1e-05, %v1363_v48 }
 0x7f2   :  { %4109 = vrsqrt.f32 %v1366_v30 }
 0x7fc   :  { %v4110_v55 = vpop.eup %4109 }
 0x7fd   :  { %v1372_v57 = vmul.f32 %v4110_v55, %v1348_v27 }
 0x7ff   :  { %v1379_v58 = vmul.f32 %v3191_v24, %v1372_v57 }
 0x801   :  { %v4715_v59 = vadd.f32 %v3192_v39, %v1379_v58 }
 0x803   :  { %3613 = vmatmul.mubr.msk.f32.gmra.mrb[32].mxu1 %vm155_vm2, %v4715_v59 }
 0x804   :  { %3648 = vmatprep.mubr.msk.f32.mxu1 %vm4213_vm0, %v4214_v4 }
 0x8a9   :  { %v1466_v7 = vpop.f32.mrb[28].mxu1 }
 0x8aa   :  { %v1467_v9 = vadd.f32 %v3193_v6, %v1466_v7  ;;  %v3608_v3 = vpop.f32.mrb[29].mxu1 }
 0x8ac   :  { %v1483_v11 = vmul.f32 0.70710677, %v1467_v9  ;;  %v1480_v21 = vmul.f32 0.5, %v1467_v9 }
 0x8ae   :  { %4111 = verf.f32 %v1483_v11 }
 0x8b1   :  { %v1471_v17 = vpop.f32.mrb[30].mxu1 }
 0x8b2   :  { %v1472_v12 = vadd.f32 %v3193_v6, %v1471_v17  ;;  %v3611_v15 = vpop.f32.mrb[31].mxu1 }
 0x8b4   :  { %v1484_v10 = vmul.f32 0.70710677, %v1472_v12  ;;  %v1481_v36 = vmul.f32 0.5, %v1472_v12 }
 0x8b6   :  { %4113 = verf.f32 %v1484_v10  ;;  %v3201_v10 = vld [vmem:[%s5239_s4 + $0x6] ss:$0 sm:$0xff] }
 0x8b8   :  { %v4112_v16 = vpop.eup %4111 }
 0x8b9   :  { %v1489_v8 = vadd.f32 1.0, %v4112_v16 }
 0x8bb   :  { %v1492_v34 = vmul.f32 %v1489_v8, %v1480_v21  ;;  %v3202_v21 = vld [vmem:[%s5239_s4 + $0x7] ss:$0 sm:$0xff] }
 0x8bd   :  { %3632 = vmatmul.mubr.msk.f32.vlgmr.msra.gmra.mrb[38].mxu0 %vm1499_vm10, %v1492_v34 }
 0x8be   :  { %3634 = vmatprep.mubr.msk.f32.mxu0 %vm4213_vm0, %v4214_v4 }
 0x8c0   :  { %v4114_v13 = vpop.eup %4113 }
 0x8c1   :  { %v1490_v25 = vadd.f32 1.0, %v4114_v13 }
 0x8c3   :  { %v1493_v60 = vmul.f32 %v1490_v25, %v1481_v36 }
 0x8c5   :  { %3635 = vmatmul.mubr.msk.f32.gmra.mrb[40].mxu0 %vm1499_vm10, %v1493_v60 }
 0x8c6   :  { %3637 = vmatprep.mubr.msk.f32.mxu0 %vm4213_vm0, %v4214_v4 }
 0x8d6   :  { %v1476_v20 = vpop.f32.mrb[32].mxu1 }
 0x8d7   :  { %v1477_v19 = vadd.f32 %v3193_v6, %v1476_v20  ;;  %v3614_v22 = vpop.f32.mrb[33].mxu1 }
 0x8d9   :  { %v1485_v23 = vmul.f32 0.70710677, %v1477_v19  ;;  %v1482_v14 = vmul.f32 0.5, %v1477_v19 }
 0x8db   :  { %4115 = verf.f32 %v1485_v23 }
 0x8e5   :  { %v4116_v26 = vpop.eup %4115 }
 0x8e6   :  { %v1491_v27 = vadd.f32 1.0, %v4116_v26 }
 0x8e8   :  { %v1494_v28 = vmul.f32 %v1491_v27, %v1482_v14 }
 0x8ea   :  { %3638 = vmatmul.mubr.msk.f32.gmra.mrb[42].mxu0 %vm1499_vm10, %v1494_v28 }
 0x8eb   :  { %3678 = vmatprep.mubr.msk.f32.mxu0 %vm4213_vm0, %v4214_v4 }
 0x990   :  { %v1575_v18 = vpop.f32.mrb[38].mxu0 }
 0x991   :  { %v1576_v31 = vadd.f32 %v3197_v29, %v1575_v18  ;;  %v3633_v32 = vpop.f32.mrb[39].mxu0  ;;  %v3203_v18 = vld [vmem:[%s5239_s4 + $0x8] ss:$0 sm:$0xff] }
 0x993   :  { %v1589_v35 = vadd.f32 %v1576_v31, %v4703_v46 }
 0x995   :  { %v1592_v33 = vsel %vm155_vm2, %v1589_v35, 0.0 }
 0x996   :  { %1593 = vadd.xlane.f32.xlu0 %v1592_v33 }
 0x998   :  { %v1580_v38 = vpop.f32.mrb[40].mxu0 }
 0x999   :  { %v1581_v40 = vadd.f32 %v3197_v29, %v1580_v38  ;;  %v3636_v24 = vpop.f32.mrb[41].mxu0 }
 0x99b   :  { %v1590_v42 = vadd.f32 %v1581_v40, %v4709_v51 }
 0x99d   :  { %v1595_v39 = vsel %vm155_vm2, %v1590_v42, 0.0 }
 0x99e   :  { %1596 = vadd.xlane.f32.xlu1 %v1595_v39 }
 0x9bd   :  { %v1585_v45 = vpop.f32.mrb[42].mxu0 }
 0x9be   :  { %v1586_v47 = vadd.f32 %v3197_v29, %v1585_v45  ;;  %v3639_v44 = vpop.f32.mrb[43].mxu0 }
 0x9c0   :  { %v1591_v50 = vadd.f32 %v1586_v47, %v4715_v59  ;;  %v1645_v59 = vld [vmem:[%s5238_s3 + $0xb8] sm:$0xff] }
 0x9c1   :  { %v3898_v63 = vpack.c.bf16 %v1646_v62, %v1645_v59 }
 0x9c2   :  { %v1598_v53 = vsel %vm1338_vm9, %v1591_v50, 0.0 }
 0x9c3   :  { %1599 = vadd.xlane.f32.xlu0 %v1598_v53  ;;  %3899 = vmatpush3.bf16.msra.mxu1 %v3898_v63 }
 0x9c4   :  { %3900 = vmatprep.subr.bf16.mxu1 %v4212_v2 }
 0x9c7   :  { %3902 = vmatpush3.bf16.msra.mxu1 %v3901_v54 }
 0x9c8   :  { %3903 = vmatprep.subr.bf16.mxu1 %v4212_v2 }
 0xa23   :  { %v1594_v46 = vpop.xlane.xlu0 %1593 }
 0xa24   :  { %v1601_v48 = vmul.f32 0.03125, %v1594_v46 }
 0xa26   :  { %v1604_v30 = vsub.f32 %v1589_v35, %v1601_v48 }
 0xa28   :  { %v1607_v55 = vmul.f32 %v1604_v30, %v1604_v30 }
 0xa2a   :  { %v1610_v57 = vsel %vm155_vm2, %v1607_v55, 0.0 }
 0xa2b   :  { %1611 = vadd.xlane.f32.xlu1 %v1610_v57  ;;  %v1597_v58 = vpop.xlane.xlu1 %1596 }
 0xa2c   :  { %v1602_v51 = vmul.f32 0.03125, %v1597_v58 }
 0xa2e   :  { %v1605_v37 = vsub.f32 %v1590_v42, %v1602_v51 }
 0xa30   :  { %v1608_v61 = vmul.f32 %v1605_v37, %v1605_v37 }
 0xa32   :  { %v1613_v43 = vsel %vm155_vm2, %v1608_v61, 0.0 }
 0xa33   :  { %1614 = vadd.xlane.f32.xlu0 %v1613_v43 }
 0xa50   :  { %v1600_v0 = vpop.xlane.xlu0 %1599 }
 0xa51   :  { %v1603_v1 = vmul.f32 0.03125, %v1600_v0 }
 0xa53   :  { %v1606_v52 = vsub.f32 %v1591_v50, %v1603_v1 }
 0xa55   :  { %v1609_v5 = vmul.f32 %v1606_v52, %v1606_v52 }
 0xa57   :  { %v1616_v6 = vsel %vm1338_vm9, %v1609_v5, 0.0 }
 0xa58   :  { %1617 = vadd.xlane.f32.xlu1 %v1616_v6 }
 0xab8   :  { %v1612_v7 = vpop.xlane.xlu1 %1611 }
 0xab9   :  { %v1619_v9 = vmul.f32 0.03125, %v1612_v7 }
 0xabb   :  { %v1622_v3 = vadd.f32 1e-05, %v1619_v9 }
 0xabd   :  { %4117 = vrsqrt.f32 %v1622_v3 }
 0xac0   :  { %v1615_v11 = vpop.xlane.xlu0 %1614 }
 0xac1   :  { %v1620_v17 = vmul.f32 0.03125, %v1615_v11 }
 0xac3   :  { %v1623_v12 = vadd.f32 1e-05, %v1620_v17 }
 0xac5   :  { %4119 = vrsqrt.f32 %v1623_v12 }
 0xac7   :  { %v4118_v15 = vpop.eup %4117 }
 0xac8   :  { %v1628_v16 = vmul.f32 %v4118_v15, %v1604_v30 }
 0xaca   :  { %v1635_v8 = vmul.f32 %v3201_v10, %v1628_v16 }
 0xacc   :  { %v4793_v34 = vadd.f32 %v3202_v21, %v1635_v8 }
 0xace   :  { %3649 = vmatmul.mubr.msk.f32.vlgmr.msra.gmra.mrb[34].mxu1 %vm155_vm2, %v4793_v34 }
 0xacf   :  { %v4120_v13 = vpop.eup %4119  ;;  %3651 = vmatprep.mubr.msk.f32.mxu1 %vm4213_vm0, %v4214_v4 }
 0xad0   :  { %v1629_v36 = vmul.f32 %v4120_v13, %v1605_v37 }
 0xad2   :  { %v1636_v25 = vmul.f32 %v3201_v10, %v1629_v36  ;;  %v4917_v36 = vld [vmem:[%s5236_s1 + $0x8] sm:$0xff] }
 0xad4   :  { %v4799_v60 = vadd.f32 %v3202_v21, %v1636_v25 }
 0xad6   :  { %3652 = vmatmul.mubr.msk.f32.gmra.mrb[36].mxu1 %vm155_vm2, %v4799_v60 }
 0xad7   :  { %3654 = vmatprep.mubr.msk.f32.mxu1 %vm4213_vm0, %v4214_v4 }
 0xae5   :  { %v1618_v20 = vpop.xlane.xlu1 %1617 }
 0xae6   :  { %v1621_v19 = vmul.f32 0.03125, %v1618_v20 }
 0xae8   :  { %v1624_v22 = vadd.f32 1e-05, %v1621_v19 }
 0xaea   :  { %4121 = vrsqrt.f32 %v1624_v22 }
 0xaf4   :  { %v4122_v23 = vpop.eup %4121 }
 0xaf5   :  { %v1630_v26 = vmul.f32 %v4122_v23, %v1606_v52  ;;  %v4924_v23 = vld [vmem:[%s5236_s1 + $0x10] sm:$0xf] }
 0xaf7   :  { %v1637_v14 = vmul.f32 %v3201_v10, %v1630_v26  ;;  %v4185_v10 = vld [vmem:[%s5236_s1] sm:$0xff] }
 0xaf9   :  { %v4805_v27 = vadd.f32 %v3202_v21, %v1637_v14 }
 0xafb   :  { %3655 = vmatmul.mubr.msk.f32.gmra.mrb[38].mxu1 %vm155_vm2, %v4805_v27 }
 0xafc   :  { %3663 = vmatprep.mubr.msk.f32.mxu1 %vm4213_vm0, %v4214_v4 }
 0xba1   :  { %v1752_v28 = vpop.f32.mrb[34].mxu1 }
 0xba2   :  { %v3650_v29 = vpop.f32.mrb[35].mxu1  ;;  %v1753_v32 = vadd.f32 %v3203_v18, %v1752_v28 }
 0xba9   :  { %v1757_v31 = vpop.f32.mrb[36].mxu1 }
 0xbaa   :  { %v1758_v35 = vadd.f32 %v3203_v18, %v1757_v31  ;;  %v3653_v33 = vpop.f32.mrb[37].mxu1 }
 0xbac   :  { %v4814_v38 = vpack.i.bf16 %v1758_v35, %v1753_v32 }
 0xbae   :  { %4018 = vrot.lane.b32.xlu0 %v4814_v38, %s4216_s20 }
 0xbce   :  { %v1762_v40 = vpop.f32.mrb[38].mxu1 }
 0xbcf   :  { %v4818_v24 = vadd.f32 %v3203_v18, %v1762_v40  ;;  %v3656_v42 = vpop.f32.mrb[39].mxu1 }
 0xbd1   :  { %2009 = vrot.lane.b32.xlu0 %v4818_v24, %s4215_s19  ;;  %1773 = vrot.lane.b32.xlu1 %v4818_v24, %s4216_s20 }
 0xbd5   :  { %1999 = vrot.lane.b32.xlu0 %v1753_v32, %s4217_s21  ;;  %4023 = vrot.lane.b32.xlu1 %v4814_v38, %s4215_s19 }
 0xbd9   :  { %2003 = vrot.lane.b32.xlu0 %v4818_v24, %s4217_s21  ;;  %4028 = vrot.lane.b32.xlu1 %v4814_v38, %s4218_s22 }
 0xbdd   :  { %4033 = vrot.lane.b32.xlu0 %v4814_v38, %s4219_s23  ;;  %2001 = vrot.lane.b32.xlu1 %v1758_v35, %s4217_s21 }
 0xbe1   :  { %2237 = vrot.lane.b32.xlu0 %v1758_v35, %s4220_s24  ;;  %2245 = vrot.lane.b32.xlu1 %v4818_v24, %s4218_s22 }
 0xbe5   :  { %2481 = vrot.lane.b32.xlu0 %v4818_v24, %s4219_s23  ;;  %2235 = vrot.lane.b32.xlu1 %v1753_v32, %s4220_s24 }
 0xbe9   :  { %2473 = vrot.lane.b32.xlu0 %v1758_v35, %s4221_s25  ;;  %2239 = vrot.lane.b32.xlu1 %v4818_v24, %s4220_s24 }
 0xbed   :  { %4038 = vrot.lane.b32.xlu0 %v4814_v38, %s4222_s7  ;;  %2471 = vrot.lane.b32.xlu1 %v1753_v32, %s4221_s25 }
 0xbf1   :  { %2475 = vrot.lane.b32.xlu1 %v4818_v24, %s4221_s25 }
 0xbf5   :  { %1904 = vrot.lane.b32.xlu1 %v4818_v24, %s4222_s7 }
 0xc20   :  { %v4019_v39 = vpop.permute.xlu0 %4018 }
 0xc21   :  { %v4021_v45 = vunpack.i.h.bf16 %v4019_v39  ;;  %v4020_v47 = vunpack.i.l.bf16 %v4019_v39 }
 0xc23   :  { %v3904_v44 = vpack.c.bf16 %v4021_v45, %v4020_v47 }
 0xc25   :  { %3906 = vmatpush3.bf16.xpose.msk.msra.mxu1 %vm4373_vm4, %v3904_v44 }
 0xc26   :  { %3661 = vmatprep.subr.mxu1 %v4214_v4 }
 0xc43   :  { %v2010_v50 = vpop.permute.xlu0 %2009  ;;  %v1774_v53 = vpop.permute.xlu1 %1773 }
 0xc44   :  { %3662 = vmatpush3.xpose.msk.msra.mxu1 %vm254_vm3, %v1774_v53 }
 0xc45   :  { %3910 = vmatprep.subr.bf16.mxu1 %v4212_v2 }
 0xc47   :  { %v2000_v46 = vpop.permute.xlu0 %1999  ;;  %3664 = vmatmul.mubr.msk.f32.vlgmr.msra.gmra.mrb[40].mxu1 %vm254_vm3, %v1753_v32  ;;  %v4024_v48 = vpop.permute.xlu1 %4023 }
 0xc48   :  { %v4026_v30 = vunpack.i.h.bf16 %v4024_v48  ;;  %v4025_v55 = vunpack.i.l.bf16 %v4024_v48  ;;  %3666 = vmatprep.mubr.msk.f32.mxu1 %vm4213_vm0, %v4214_v4 }
 0xc4a   :  { %v3911_v57 = vpack.c.bf16 %v4026_v30, %v4025_v55 }
 0xc4b   :  { %v2004_v58 = vpop.permute.xlu0 %2003  ;;  %3667 = vmatmul.mubr.msk.f32.gmra.mrb[42].mxu1 %vm254_vm3, %v1758_v35  ;;  %v4029_v51 = vpop.permute.xlu1 %4028 }
 0xc4c   :  { %3913 = vmatpush3.bf16.xpose.msk.msra.mxu1 %vm4373_vm4, %v3911_v57  ;;  %3669 = vmatprep.mubr.msk.f32.mxu1 %vm4213_vm0, %v4214_v4  ;;  %v4031_v43 = vunpack.i.h.bf16 %v4029_v51  ;;  %v4030_v59 = vunpack.i.l.bf16 %v4029_v51 }
 0xc4d   :  { %3691 = vmatprep.subr.mxu1 %v4214_v4 }
 0xc4e   :  { %v3918_v49 = vpack.c.bf16 %v4031_v43, %v4030_v59 }
 0xc4f   :  { %v4034_v37 = vpop.permute.xlu0 %4033  ;;  %3670 = vmatmul.mubr.msk.f32.gmra.mrb[44].mxu1 %vm254_vm3, %v4818_v24  ;;  %v2002_v61 = vpop.permute.xlu1 %2001 }
 0xc50   :  { %3693 = vmatprep.mubr.msk.f32.mxu1 %vm4213_vm0, %v4214_v4  ;;  %v4036_v52 = vunpack.i.h.bf16 %v4034_v37  ;;  %v4035_v5 = vunpack.i.l.bf16 %v4034_v37 }
 0xc52   :  { %v3925_v11 = vpack.c.bf16 %v4036_v52, %v4035_v5 }
 0xc53   :  { %v2238_v62 = vpop.permute.xlu0 %2237  ;;  %v2246_v63 = vpop.permute.xlu1 %2245 }
 0xc54   :  { %3692 = vmatpush3.xpose.msk.msra.mxu1 %vm254_vm3, %v2010_v50 }
 0xc55   :  { %3917 = vmatprep.subr.bf16.mxu1 %v4212_v2 }
 0xc57   :  { %v2482_v56 = vpop.permute.xlu0 %2481  ;;  %v2236_v54 = vpop.permute.xlu1 %2235  ;;  %3694 = vmatmul.mubr.msk.f32.vlgmr.msra.gmra.mrb[46].mxu1 %vm254_vm3, %v2000_v46 }
 0xc58   :  { %3920 = vmatpush3.bf16.xpose.msk.msra.mxu1 %vm4373_vm4, %v3918_v49  ;;  %3696 = vmatprep.mubr.msk.f32.mxu1 %vm4213_vm0, %v4214_v4 }
 0xc59   :  { %3721 = vmatprep.subr.mxu1 %v4214_v4 }
 0xc5b   :  { %v2474_v0 = vpop.permute.xlu0 %2473  ;;  %v2240_v1 = vpop.permute.xlu1 %2239  ;;  %3697 = vmatmul.mubr.msk.f32.gmra.mrb[48].mxu1 %vm254_vm3, %v2002_v61 }
 0xc5c   :  { %3699 = vmatprep.mubr.msk.f32.mxu1 %vm4213_vm0, %v4214_v4 }
 0xc5f   :  { %v4039_v6 = vpop.permute.xlu0 %4038  ;;  %v2472_v7 = vpop.permute.xlu1 %2471  ;;  %3700 = vmatmul.mubr.msk.f32.gmra.mrb[50].mxu1 %vm254_vm3, %v2004_v58 }
 0xc60   :  { %v4041_v9 = vunpack.i.h.bf16 %v4039_v6  ;;  %v4040_v3 = vunpack.i.l.bf16 %v4039_v6  ;;  %3722 = vmatpush3.xpose.msk.msra.mxu1 %vm254_vm3, %v2246_v63  ;;  %3723 = vmatprep.mubr.msk.f32.mxu1 %vm4213_vm0, %v4214_v4 }
 0xc61   :  { %3924 = vmatprep.subr.bf16.mxu1 %v4212_v2 }
 0xc62   :  { %v3908_v17 = vpack.c.bf16 %v4041_v9, %v4040_v3 }
 0xc63   :  { %v2476_v12 = vpop.permute.xlu1 %2475  ;;  %3724 = vmatmul.mubr.msk.f32.vlgmr.msra.gmra.mrb[52].mxu1 %vm254_vm3, %v2236_v54 }
 0xc64   :  { %3909 = vmatpush3.bf16.msra.mxu0 %v3908_v17  ;;  %3927 = vmatpush3.bf16.xpose.msk.msra.mxu1 %vm4373_vm4, %v3925_v11 }
 0xc65   :  { %3726 = vmatprep.mubr.msk.f32.mxu1 %vm4213_vm0, %v4214_v4  ;;  %3676 = vmatprep.subr.mxu0 %v4214_v4 }
 0xc66   :  { %3751 = vmatprep.subr.mxu1 %v4214_v4 }
 0xc67   :  { %v1905_v15 = vpop.permute.xlu1 %1904  ;;  %3727 = vmatmul.mubr.msk.f32.gmra.mrb[54].mxu1 %vm254_vm3, %v2238_v62 }
 0xc68   :  { %3677 = vmatpush3.msk.msra.mxu0 %vm399_vm7, %v1905_v15  ;;  %3729 = vmatprep.mubr.msk.f32.mxu1 %vm4213_vm0, %v4214_v4 }
 0xc69   :  { %3914 = vmatprep.subr.bf16.mxu0 %v4212_v2 }
 0xc6b   :  { %3730 = vmatmul.mubr.msk.f32.gmra.mrb[56].mxu1 %vm254_vm3, %v2240_v1 }
 0xc6c   :  { %3752 = vmatpush3.xpose.msk.msra.mxu1 %vm254_vm3, %v2482_v56  ;;  %3753 = vmatprep.mubr.msk.f32.mxu1 %vm4213_vm0, %v4214_v4 }
 0xc6d   :  { %3931 = vmatprep.subr.bf16.mxu1 %v4212_v2 }
 0xc6f   :  { %3754 = vmatmul.mubr.msk.f32.vlgmr.msra.gmra.mrb[58].mxu1 %vm254_vm3, %v2472_v7 }
 0xc70   :  { %3756 = vmatprep.mubr.msk.f32.mxu1 %vm4213_vm0, %v4214_v4 }
 0xc73   :  { %3757 = vmatmul.mubr.msk.f32.gmra.mrb[60].mxu1 %vm254_vm3, %v2474_v0 }
 0xc74   :  { %3759 = vmatprep.mubr.msk.f32.mxu1 %vm4213_vm0, %v4214_v4 }
 0xc77   :  { %3760 = vmatmul.mubr.msk.f32.gmra.mrb[62].mxu1 %vm254_vm3, %v2476_v12 }
 0xc78   :  { %3785 = vmatprep.mubr.msk.f32.mxu1 %vm4213_vm0, %v4214_v4 }
 0xd1a   :  { %v1853_v41 = vpop.f32.mrb[40].mxu1 }
 0xd1b   :  { %v1854_v16 = vadd.f32 %v4185_v10, %v1853_v41  ;;  %v3665_v21 = vpop.f32.mrb[41].mxu1 }
 0xd1d   :  { %v1867_v8 = vsel %vm347_vm5, %v1854_v16, -inf }
 0xd1e   :  { %1868 = vmax.xlane.f32.xlu0 %v1867_v8  ;;  %v1858_v13 = vpop.f32.mrb[42].mxu1 }
 0xd1f   :  { %v1859_v25 = vadd.f32 %v4917_v36, %v1858_v13  ;;  %v3668_v20 = vpop.f32.mrb[43].mxu1 }
 0xd21   :  { %v1870_v19 = vsel %vm347_vm5, %v1859_v25, -inf }
 0xd22   :  { %1871 = vmax.xlane.f32.xlu1 %v1870_v19  ;;  %v1863_v22 = vpop.f32.mrb[44].mxu1 }
 0xd23   :  { %v1864_v26 = vadd.f32 %v4924_v23, %v1863_v22  ;;  %v3671_v14 = vpop.f32.mrb[45].mxu1 }
 0xd25   :  { %v1873_v28 = vsel %vm354_vm6, %v1864_v26, -inf }
 0xd26   :  { %1874 = vmax.xlane.f32.xlu0 %v1873_v28 }
 0xd2a   :  { %v2089_v29 = vpop.f32.mrb[46].mxu1 }
 0xd2b   :  { %v2090_v18 = vadd.f32 %v4185_v10, %v2089_v29  ;;  %v3695_v31 = vpop.f32.mrb[47].mxu1 }
 0xd2d   :  { %v2103_v32 = vsel %vm347_vm5, %v2090_v18, -inf }
 0xd2e   :  { %2104 = vmax.xlane.f32.xlu0 %v2103_v32  ;;  %v2094_v35 = vpop.f32.mrb[48].mxu1 }
 0xd2f   :  { %v4930_v33 = vadd.f32 %v4917_v36, %v2094_v35  ;;  %v3698_v40 = vpop.f32.mrb[49].mxu1 }
 0xd31   :  { %v2106_v42 = vsel %vm347_vm5, %v4930_v33, -inf }
 0xd32   :  { %2107 = vmax.xlane.f32.xlu1 %v2106_v42  ;;  %v2099_v39 = vpop.f32.mrb[50].mxu1 }
 0xd33   :  { %v4935_v45 = vadd.f32 %v4924_v23, %v2099_v39  ;;  %v3701_v47 = vpop.f32.mrb[51].mxu1 }
 0xd35   :  { %v2109_v44 = vsel %vm354_vm6, %v4935_v45, -inf }
 0xd36   :  { %2110 = vmax.xlane.f32.xlu0 %v2109_v44  ;;  %v2325_v50 = vpop.f32.mrb[52].mxu1 }
 0xd37   :  { %v4939_v53 = vadd.f32 %v4185_v10, %v2325_v50  ;;  %v3725_v46 = vpop.f32.mrb[53].mxu1 }
 0xd39   :  { %v2339_v48 = vsel %vm347_vm5, %v4939_v53, -inf }
 0xd3a   :  { %2340 = vmax.xlane.f32.xlu1 %v2339_v48  ;;  %v2330_v30 = vpop.f32.mrb[54].mxu1 }
 0xd3b   :  { %v4944_v55 = vadd.f32 %v4917_v36, %v2330_v30  ;;  %v3728_v57 = vpop.f32.mrb[55].mxu1 }
 0xd3d   :  { %v2342_v58 = vsel %vm347_vm5, %v4944_v55, -inf }
 0xd3e   :  { %2343 = vmax.xlane.f32.xlu0 %v2342_v58  ;;  %v2335_v51 = vpop.f32.mrb[56].mxu1 }
 0xd3f   :  { %v4949_v37 = vadd.f32 %v4924_v23, %v2335_v51  ;;  %v3731_v61 = vpop.f32.mrb[57].mxu1 }
 0xd41   :  { %v2345_v43 = vsel %vm354_vm6, %v4949_v37, -inf }
 0xd42   :  { %2346 = vmax.xlane.f32.xlu1 %v2345_v43  ;;  %v2561_v59 = vpop.f32.mrb[58].mxu1 }
 0xd43   :  { %v2562_v62 = vadd.f32 %v4185_v10, %v2561_v59  ;;  %v3755_v63 = vpop.f32.mrb[59].mxu1 }
 0xd45   :  { %v2575_v49 = vsel %vm347_vm5, %v2562_v62, -inf }
 0xd46   :  { %2576 = vmax.xlane.f32.xlu0 %v2575_v49  ;;  %v4954_v56 = vpop.f32.mrb[60].mxu1 }
 0xd47   :  { %v3758_v54 = vpop.f32.mrb[61].mxu1  ;;  %v5017_v49 = vadd.f32 %v4917_v36, %v4954_v56 }
 0xd4a   :  { %v4956_v0 = vpop.f32.mrb[62].mxu1 }
 0xd4b   :  { %v3761_v1 = vpop.f32.mrb[63].mxu1  ;;  %v5021_v54 = vadd.f32 %v4924_v23, %v4956_v0 }
 0xd4c   :  { %v2578_v1 = vsel %vm347_vm5, %v5017_v49, -inf }
 0xd53   :  { %4043 = vrot.lane.b32.xlu1 %v4814_v38, %s4223_s8 }
 0xd5c   :  { %2140 = vrot.lane.b32.xlu0 %v4818_v24, %s4223_s8 }
 0xdab   :  { %v1869_v52 = vpop.xlane.xlu0 %1868 }
 0xdac   :  { %v1876_v5 = vsub.f32 %v1854_v16, %v1869_v52  ;;  %v2581_v52 = vsel %vm354_vm6, %v5021_v54, -inf }
 0xdae   :  { %v1879_v6 = vmul.f32 1.442695, %v1876_v5 }
 0xdaf   :  { %v1872_v7 = vpop.xlane.xlu1 %1871 }
 0xdb0   :  { %4123 = vpow2.f32 %v1879_v6  ;;  %v1877_v9 = vsub.f32 %v1859_v25, %v1872_v7 }
 0xdb2   :  { %v1881_v3 = vmul.f32 1.442695, %v1877_v9 }
 0xdb3   :  { %v1875_v11 = vpop.xlane.xlu0 %1874 }
 0xdb4   :  { %4125 = vpow2.f32 %v1881_v3  ;;  %v1878_v17 = vsub.f32 %v1864_v26, %v1875_v11 }
 0xdb6   :  { %v1883_v12 = vmul.f32 1.442695, %v1878_v17 }
 0xdb8   :  { %4127 = vpow2.f32 %v1883_v12 }
 0xdba   :  { %v4962_v15 = vpop.eup %4123 }
 0xdbb   :  { %v2105_v41 = vpop.xlane.xlu0 %2104  ;;  %v1885_v10 = vsel %vm347_vm5, %v4962_v15, 0.0 }
 0xdbc   :  { %v2112_v21 = vsub.f32 %v2090_v18, %v2105_v41  ;;  %1886 = vadd.xlane.f32.xlu1 %v1885_v10 }
 0xdbe   :  { %v4966_v8 = vpop.eup %4125  ;;  %v2115_v16 = vmul.f32 1.442695, %v2112_v21 }
 0xdbf   :  { %v1888_v13 = vsel %vm347_vm5, %v4966_v8, 0.0  ;;  %v2108_v26 = vpop.xlane.xlu1 %2107 }
 0xdc0   :  { %4129 = vpow2.f32 %v2115_v16  ;;  %1889 = vadd.xlane.f32.xlu0 %v1888_v13  ;;  %v2113_v14 = vsub.f32 %v4930_v33, %v2108_v26 }
 0xdc2   :  { %v4970_v25 = vpop.eup %4127  ;;  %v2117_v29 = vmul.f32 1.442695, %v2113_v14 }
 0xdc3   :  { %v1891_v20 = vsel %vm354_vm6, %v4970_v25, 0.0  ;;  %v2111_v28 = vpop.xlane.xlu0 %2110 }
 0xdc4   :  { %1892 = vadd.xlane.f32.xlu1 %v1891_v20  ;;  %v2114_v18 = vsub.f32 %v4935_v45, %v2111_v28  ;;  %4131 = vpow2.f32 %v2117_v29 }
 0xdc6   :  { %v2119_v40 = vmul.f32 1.442695, %v2114_v18 }
 0xdc7   :  { %v2341_v31 = vpop.xlane.xlu1 %2340 }
 0xdc8   :  { %v2348_v35 = vsub.f32 %v4939_v53, %v2341_v31  ;;  %4133 = vpow2.f32 %v2119_v40 }
 0xdca   :  { %v4974_v19 = vpop.eup %4129  ;;  %v2351_v44 = vmul.f32 1.442695, %v2348_v35 }
 0xdcb   :  { %v2121_v22 = vsel %vm347_vm5, %v4974_v19, 0.0  ;;  %v2344_v32 = vpop.xlane.xlu0 %2343 }
 0xdcc   :  { %2122 = vadd.xlane.f32.xlu0 %v2121_v22  ;;  %v2349_v42 = vsub.f32 %v4944_v55, %v2344_v32  ;;  %4135 = vpow2.f32 %v2351_v44 }
 0xdce   :  { %v2353_v46 = vmul.f32 1.442695, %v2349_v42  ;;  %v4987_v30 = vpop.eup %4131 }
 0xdcf   :  { %v2347_v39 = vpop.xlane.xlu1 %2346  ;;  %v2124_v53 = vsel %vm347_vm5, %v4987_v30, 0.0 }
 0xdd0   :  { %v2350_v50 = vsub.f32 %v4949_v37, %v2347_v39  ;;  %4137 = vpow2.f32 %v2353_v46 }
 0xdd2   :  { %v2355_v48 = vmul.f32 1.442695, %v2350_v50  ;;  %v4991_v55 = vpop.eup %4133 }
 0xdd3   :  { %v2577_v47 = vpop.xlane.xlu0 %2576  ;;  %v2127_v58 = vsel %vm354_vm6, %v4991_v55, 0.0 }
 0xdd4   :  { %v2584_v33 = vsub.f32 %v2562_v62, %v2577_v47  ;;  %4139 = vpow2.f32 %v2355_v48 }
 0xdd5   :  { %4048 = vrot.lane.b32.xlu1 %v4814_v38, %s4224_s9 }
 0xdd6   :  { %v2587_v45 = vmul.f32 1.442695, %v2584_v33  ;;  %v4993_v57 = vpop.eup %4135 }
 0xdd7   :  { %v2357_v61 = vsel %vm347_vm5, %v4993_v57, 0.0  ;;  %v2141_v5 = vpop.permute.xlu0 %2140 }
 0xdd8   :  { %4141 = vpow2.f32 %v2587_v45 }
 0xdda   :  { %v4997_v51 = vpop.eup %4137 }
 0xddb   :  { %v2360_v43 = vsel %vm347_vm5, %v4997_v51, 0.0 }
 0xdde   :  { %v4999_v37 = vpop.eup %4139 }
 0xddf   :  { %v2363_v62 = vsel %vm354_vm6, %v4999_v37, 0.0 }
 0xde2   :  { %2376 = vrot.lane.b32.xlu0 %v4818_v24, %s4224_s9  ;;  %v5005_v59 = vpop.eup %4141 }
 0xde3   :  { %v2593_v63 = vsel %vm347_vm5, %v5005_v59, 0.0 }
 0xdf9   :  { %2125 = vadd.xlane.f32.xlu1 %v2124_v53 }
 0xdfd   :  { %2128 = vadd.xlane.f32.xlu1 %v2127_v58 }
 0xe01   :  { %2358 = vadd.xlane.f32.xlu1 %v2357_v61  ;;  %2361 = vadd.xlane.f32.xlu0 %v2360_v43 }
 0xe05   :  { %2364 = vadd.xlane.f32.xlu1 %v2363_v62  ;;  %2594 = vadd.xlane.f32.xlu0 %v2593_v63 }
 0xe16   :  { %2612 = vrot.lane.b32.xlu1 %v4818_v24, %s4225_s10  ;;  %v4044_v24 = vpop.permute.xlu1 %4043 }
 0xe17   :  { %v4046_v56 = vunpack.i.h.bf16 %v4044_v24  ;;  %v4045_v7 = vunpack.i.l.bf16 %v4044_v24 }
 0xe19   :  { %v3915_v9 = vpack.c.bf16 %v4046_v56, %v4045_v7  ;;  %v1649_v56 = vld [vmem:[%s5238_s3 + $0xd8] sm:$0xff]  ;;  %v1650_v7 = vld [vmem:[%s5238_s3 + $0xe0] sm:$0xff] }
 0xe1b   :  { %4053 = vrot.lane.b32.xlu0 %v4814_v38, %s4225_s10 }
 0xe3a   :  { %2579 = vmax.xlane.f32.xlu0 %v2578_v1  ;;  %2582 = vmax.xlane.f32.xlu1 %v2581_v52 }
 0xe49   :  { %v1887_v6 = vpop.xlane.xlu1 %1886 }
 0xe4a   :  { %4143 = vrcp.f32 %v1887_v6 }
 0xe4d   :  { %v1890_v38 = vpop.xlane.xlu0 %1889 }
 0xe4e   :  { %4145 = vrcp.f32 %v1890_v38 }
 0xe51   :  { %v1893_v36 = vpop.xlane.xlu1 %1892 }
 0xe52   :  { %4147 = vrcp.f32 %v1893_v36 }
 0xe54   :  { %v4144_v23 = vpop.eup %4143 }
 0xe55   :  { %v1895_v0 = vmul.f32 %v4144_v23, %v4962_v15  ;;  %v4049_v41 = vpop.permute.xlu1 %4048 }
 0xe56   :  { %v4051_v10 = vunpack.i.h.bf16 %v4049_v41  ;;  %v4050_v21 = vunpack.i.l.bf16 %v4049_v41 }
 0xe57   :  { %3679 = vmatmul.mubr.msk.f32.vlgmr.msra.gmra.mrb[44].mxu0 %vm347_vm5, %v1895_v0  ;;  %v3932_v0 = vpack.c.bf16 %v1650_v7, %v1649_v56  ;;  %v1656_v56 = vld [vmem:[%s5238_s3 + $0x110] sm:$0xff] }
 0xe58   :  { %v4146_v3 = vpop.eup %4145  ;;  %3916 = vmatpush3.bf16.msra.mxu0 %v3915_v9  ;;  %3681 = vmatprep.mubr.msk.f32.mxu0 %vm4213_vm0, %v4214_v4  ;;  %v3922_v13 = vpack.c.bf16 %v4051_v10, %v4050_v21 }
 0xe59   :  { %v2123_v11 = vpop.xlane.xlu0 %2122  ;;  %3706 = vmatprep.subr.mxu0 %v4214_v4  ;;  %v1897_v17 = vmul.f32 %v4146_v3, %v4966_v8  ;;  %3933 = vmatpush3.bf16.msra.mxu1 %v3932_v0 }
 0xe5a   :  { %4149 = vrcp.f32 %v2123_v11  ;;  %3934 = vmatprep.subr.bf16.mxu1 %v4212_v2 }
 0xe5b   :  { %3682 = vmatmul.mubr.msk.f32.gmra.mrb[46].mxu0 %vm347_vm5, %v1897_v17  ;;  %v1651_v17 = vld [vmem:[%s5238_s3 + $0xe8] sm:$0xff] }
 0xe5c   :  { %v4148_v12 = vpop.eup %4147  ;;  %3707 = vmatpush3.msk.msra.mxu0 %vm399_vm7, %v2141_v5  ;;  %3684 = vmatprep.mubr.msk.f32.mxu0 %vm4213_vm0, %v4214_v4 }
 0xe5d   :  { %v1899_v15 = vmul.f32 %v4148_v12, %v4970_v25  ;;  %3921 = vmatprep.subr.bf16.mxu0 %v4212_v2  ;;  %v2377_v25 = vpop.permute.xlu0 %2376  ;;  %v1652_v12 = vld [vmem:[%s5238_s3 + $0xf0] sm:$0xff] }
 0xe5e   :  { %v3935_v41 = vpack.c.bf16 %v1652_v12, %v1651_v17 }
 0xe5f   :  { %3685 = vmatmul.mubr.msk.f32.gmra.mrb[48].mxu0 %vm347_vm5, %v1899_v15 }
 0xe60   :  { %3708 = vmatprep.mubr.msk.f32.mxu0 %vm4213_vm0, %v4214_v4  ;;  %3936 = vmatpush3.bf16.msra.mxu1 %v3935_v41 }
 0xe61   :  { %3943 = vmatprep.subr.bf16.mxu1 %v4212_v2 }
 0xe64   :  { %v4150_v8 = vpop.eup %4149 }
 0xe65   :  { %v2131_v16 = vmul.f32 %v4150_v8, %v4974_v19 }
 0xe67   :  { %3709 = vmatmul.mubr.msk.f32.vlgmr.msra.gmra.mrb[50].mxu0 %vm347_vm5, %v2131_v16 }
 0xe68   :  { %3923 = vmatpush3.bf16.msra.mxu0 %v3922_v13  ;;  %3711 = vmatprep.mubr.msk.f32.mxu0 %vm4213_vm0, %v4214_v4 }
 0xe69   :  { %3736 = vmatprep.subr.mxu0 %v4214_v4 }
 0xe6c   :  { %3737 = vmatpush3.msk.msra.mxu0 %vm399_vm7, %v2377_v25 }
 0xe6d   :  { %3928 = vmatprep.subr.bf16.mxu0 %v4212_v2 }
 0xe86   :  { %v2126_v20 = vpop.xlane.xlu1 %2125 }
 0xe87   :  { %4151 = vrcp.f32 %v2126_v20 }
 0xe8a   :  { %v2129_v22 = vpop.xlane.xlu1 %2128 }
 0xe8b   :  { %4153 = vrcp.f32 %v2129_v22 }
 0xe8e   :  { %v2359_v26 = vpop.xlane.xlu1 %2358  ;;  %v2362_v19 = vpop.xlane.xlu0 %2361 }
 0xe8f   :  { %4155 = vrcp.f32 %v2359_v26 }
 0xe90   :  { %4157 = vrcp.f32 %v2362_v19 }
 0xe91   :  { %v4152_v14 = vpop.eup %4151 }
 0xe92   :  { %v2365_v28 = vpop.xlane.xlu1 %2364  ;;  %v2595_v29 = vpop.xlane.xlu0 %2594  ;;  %v2133_v18 = vmul.f32 %v4152_v14, %v4987_v30 }
 0xe93   :  { %4159 = vrcp.f32 %v2365_v28 }
 0xe94   :  { %3712 = vmatmul.mubr.msk.f32.gmra.mrb[52].mxu0 %vm347_vm5, %v2133_v18  ;;  %4161 = vrcp.f32 %v2595_v29 }
 0xe95   :  { %v4154_v31 = vpop.eup %4153  ;;  %3714 = vmatprep.mubr.msk.f32.mxu0 %vm4213_vm0, %v4214_v4 }
 0xe96   :  { %v4054_v32 = vpop.permute.xlu0 %4053  ;;  %v2135_v35 = vmul.f32 %v4154_v31, %v4991_v55  ;;  %v2613_v48 = vpop.permute.xlu1 %2612 }
 0xe97   :  { %v4056_v40 = vunpack.i.h.bf16 %v4054_v32  ;;  %v4055_v42 = vunpack.i.l.bf16 %v4054_v32 }
 0xe98   :  { %3715 = vmatmul.mubr.msk.f32.gmra.mrb[54].mxu0 %vm347_vm5, %v2135_v35 }
 0xe99   :  { %v4156_v39 = vpop.eup %4155  ;;  %v3929_v47 = vpack.c.bf16 %v4056_v40, %v4055_v42  ;;  %3738 = vmatprep.mubr.msk.f32.mxu0 %vm4213_vm0, %v4214_v4 }
 0xe9a   :  { %v2367_v44 = vmul.f32 %v4156_v39, %v4993_v57  ;;  %v4158_v50 = vpop.eup %4157 }
 0xe9b   :  { %v2369_v46 = vmul.f32 %v4158_v50, %v4997_v51 }
 0xe9c   :  { %3739 = vmatmul.mubr.msk.f32.vlgmr.msra.gmra.mrb[56].mxu0 %vm347_vm5, %v2367_v44 }
 0xe9d   :  { %3930 = vmatpush3.bf16.msra.mxu0 %v3929_v47  ;;  %3741 = vmatprep.mubr.msk.f32.mxu0 %vm4213_vm0, %v4214_v4  ;;  %v4160_v33 = vpop.eup %4159 }
 0xe9e   :  { %3766 = vmatprep.subr.mxu0 %v4214_v4  ;;  %v2371_v45 = vmul.f32 %v4160_v33, %v4999_v37  ;;  %v4162_v30 = vpop.eup %4161 }
 0xe9f   :  { %v2603_v53 = vmul.f32 %v4162_v30, %v5005_v59 }
 0xea0   :  { %3742 = vmatmul.mubr.msk.f32.gmra.mrb[58].mxu0 %vm347_vm5, %v2369_v46 }
 0xea1   :  { %3767 = vmatpush3.msk.msra.mxu0 %vm399_vm7, %v2613_v48  ;;  %3744 = vmatprep.mubr.msk.f32.mxu0 %vm4213_vm0, %v4214_v4 }
 0xea2   :  { %3937 = vmatprep.subr.bf16.mxu0 %v4212_v2 }
 0xea4   :  { %3745 = vmatmul.mubr.msk.f32.gmra.mrb[60].mxu0 %vm347_vm5, %v2371_v45 }
 0xea5   :  { %3768 = vmatprep.mubr.msk.f32.mxu0 %vm4213_vm0, %v4214_v4 }
 0xea8   :  { %3769 = vmatmul.mubr.msk.f32.vlgmr.msra.gmra.mrb[62].mxu0 %vm347_vm5, %v2603_v53 }
 0xea9   :  { %3771 = vmatprep.mubr.msk.f32.mxu0 %vm4213_vm0, %v4214_v4 }
 0xec7   :  { %v2580_v55 = vpop.xlane.xlu0 %2579  ;;  %v2583_v57 = vpop.xlane.xlu1 %2582 }
 0xec8   :  { %v2585_v58 = vsub.f32 %v5017_v49, %v2580_v55  ;;  %v2586_v51 = vsub.f32 %v5021_v54, %v2583_v57 }
 0xeca   :  { %v2589_v37 = vmul.f32 1.442695, %v2585_v58  ;;  %v2591_v61 = vmul.f32 1.442695, %v2586_v51 }
 0xecc   :  { %4163 = vpow2.f32 %v2589_v37 }
 0xecd   :  { %4165 = vpow2.f32 %v2591_v61  ;;  %v3247_v61 = vld [vmem:[%s5239_s4 + $0x9] ss:$0 sm:$0xff] }
 0xed6   :  { %v4164_v43 = vpop.eup %4163 }
 0xed7   :  { %v2596_v62 = vsel %vm347_vm5, %v4164_v43, 0.0  ;;  %v4166_v63 = vpop.eup %4165 }
 0xed8   :  { %2597 = vadd.xlane.f32.xlu0 %v2596_v62  ;;  %v2599_v59 = vsel %vm354_vm6, %v4166_v63, 0.0 }
 0xedc   :  { %2600 = vadd.xlane.f32.xlu0 %v2599_v59 }
 0xf2a   :  { %v1985_v1 = vpop.f32.mrb[44].mxu0 }
 0xf2b   :  { %v3680_v52 = vpop.f32.mrb[45].mxu0 }
 0xf2e   :  { %v5080_v24 = vpop.f32.mrb[46].mxu0 }
 0xf2f   :  { %v3683_v5 = vpop.f32.mrb[47].mxu0 }
 0xf32   :  { %v5082_v49 = vpop.f32.mrb[48].mxu0 }
 0xf33   :  { %v3686_v54 = vpop.f32.mrb[49].mxu0 }
 0xf3a   :  { %v2221_v6 = vpop.f32.mrb[50].mxu0 }
 0xf3b   :  { %v3710_v38 = vpop.f32.mrb[51].mxu0  ;;  %2710 = vrot.lane.b32.xlu1 %v2221_v6, %s4226_s18  ;;  %v1653_v6 = vld [vmem:[%s5238_s3 + $0xf8] sm:$0xff] }
 0xf3c   :  { %v1654_v38 = vld [vmem:[%s5238_s3 + $0x100] sm:$0xff] }
 0xf65   :  { %v2598_v36 = vpop.xlane.xlu0 %2597 }
 0xf66   :  { %4167 = vrcp.f32 %v2598_v36  ;;  %v3938_v36 = vpack.c.bf16 %v1654_v38, %v1653_v6 }
 0xf67   :  { %v2226_v23 = vpop.f32.mrb[52].mxu0 }
 0xf68   :  { %v3713_v9 = vpop.f32.mrb[53].mxu0  ;;  %3939 = vmatpush3.bf16.msra.mxu0 %v3938_v36 }
 0xf69   :  { %v2601_v3 = vpop.xlane.xlu0 %2600  ;;  %3940 = vmatprep.subr.bf16.mxu0 %v4212_v2 }
 0xf6a   :  { %4169 = vrcp.f32 %v2601_v3 }
 0xf6b   :  { %v2231_v11 = vpop.f32.mrb[54].mxu0 }
 0xf6c   :  { %v3716_v15 = vpop.f32.mrb[55].mxu0 }
 0xf6f   :  { %v2457_v10 = vpop.f32.mrb[56].mxu0 }
 0xf70   :  { %v4168_v21 = vpop.eup %4167  ;;  %v3740_v8 = vpop.f32.mrb[57].mxu0  ;;  %2722 = vrot.lane.b32.xlu0 %v2457_v10, %s4227_s2 }
 0xf71   :  { %v2605_v16 = vmul.f32 %v4168_v21, %v4164_v43 }
 0xf73   :  { %v2462_v13 = vpop.f32.mrb[58].mxu0  ;;  %3772 = vmatmul.mubr.msk.f32.gmra.mrb[64].mxu0 %vm347_vm5, %v2605_v16 }
 0xf74   :  { %v4170_v25 = vpop.eup %4169  ;;  %v3743_v20 = vpop.f32.mrb[59].mxu0  ;;  %2724 = vrot.lane.b32.xlu0 %v2462_v13, %s4227_s2  ;;  %3774 = vmatprep.mubr.msk.f32.mxu0 %vm4213_vm0, %v4214_v4 }
 0xf75   :  { %v2607_v22 = vmul.f32 %v4170_v25, %v4166_v63  ;;  %v3252_v20 = vld [vmem:[%s5239_s4 + $0xb] ss:$0 sm:$0xff] }
 0xf77   :  { %v2467_v26 = vpop.f32.mrb[60].mxu0  ;;  %3775 = vmatmul.mubr.msk.f32.gmra.mrb[66].mxu0 %vm347_vm5, %v2607_v22 }
 0xf78   :  { %v3746_v19 = vpop.f32.mrb[61].mxu0  ;;  %2714 = vrot.lane.b32.xlu0 %v2231_v11, %s4226_s18  ;;  %3802 = vmatprep.mubr.msk.f32.mxu0 %vm4213_vm0, %v4214_v4 }
 0xf7b   :  { %v2693_v14 = vpop.f32.mrb[62].mxu0 }
 0xf7c   :  { %v3770_v28 = vpop.f32.mrb[63].mxu0  ;;  %2734 = vrot.lane.b32.xlu1 %v2693_v14, %s4228_s26 }
 0xf80   :  { %2712 = vrot.lane.b32.xlu1 %v2226_v23, %s4226_s18 }
 0xfad   :  { %v2711_v29 = vpop.permute.xlu1 %2710 }
 0xfae   :  { %v2743_v31 = vsel %vm254_vm3, %v1985_v1, %v2711_v29 }
 0xfe2   :  { %v2723_v18 = vpop.permute.xlu0 %2722 }
 0xfe3   :  { %v2746_v32 = vsel %vm1229_vm8, %v2743_v31, %v2723_v18 }
 0xfe6   :  { %v2725_v50 = vpop.permute.xlu0 %2724 }
 0xfea   :  { %v2715_v48 = vpop.permute.xlu0 %2714 }
 0xfeb   :  { %v2745_v55 = vsel %vm254_vm3, %v5082_v49, %v2715_v48  ;;  %v1662_v48 = vld [vmem:[%s5238_s3 + $0x140] sm:$0xff] }
 0xfee   :  { %v2735_v35 = vpop.permute.xlu1 %2734 }
 0xfef   :  { %v2749_v40 = vsel %vm33_vm1, %v2746_v32, %v2735_v35 }
 0xff0   :  { %3786 = vmatmul.mubr.msk.f32.vlgmr.msra.gmra.mrb[64].mxu1 %vm155_vm2, %v2749_v40 }
 0xff1   :  { %3788 = vmatprep.mubr.msk.f32.mxu1 %vm4213_vm0, %v4214_v4 }
 0xff2   :  { %v2713_v46 = vpop.permute.xlu1 %2712 }
 0xff3   :  { %v2744_v33 = vsel %vm254_vm3, %v5080_v24, %v2713_v46 }
 0xff4   :  { %v2747_v45 = vsel %vm1229_vm8, %v2744_v33, %v2725_v50  ;;  %v1660_v50 = vld [vmem:[%s5238_s3 + $0x130] sm:$0xff]  ;;  %v1661_v33 = vld [vmem:[%s5238_s3 + $0x138] sm:$0xff] }
0x1046   :  { %v2698_v42 = vpop.f32.mrb[64].mxu0 }
0x1047   :  { %v3773_v39 = vpop.f32.mrb[65].mxu0  ;;  %2736 = vrot.lane.b32.xlu1 %v2698_v42, %s4228_s26  ;;  %v1657_v42 = vld [vmem:[%s5238_s3 + $0x118] sm:$0xff] }
0x1048   :  { %v1658_v39 = vld [vmem:[%s5238_s3 + $0x120] sm:$0xff] }
0x104a   :  { %v2703_v47 = vpop.f32.mrb[66].mxu0 }
0x104b   :  { %2726 = vrot.lane.b32.xlu1 %v2467_v26, %s4227_s2  ;;  %2738 = vrot.lane.b32.xlu0 %v2703_v47, %s4228_s26  ;;  %v3776_v44 = vpop.f32.mrb[67].mxu0  ;;  %v3944_v47 = vpack.c.bf16 %v1658_v39, %v1657_v42 }
0x104c   :  { %v1659_v44 = vld [vmem:[%s5238_s3 + $0x128] sm:$0xff] }
0x104d   :  { %3945 = vmatpush3.bf16.msra.mxu1 %v3944_v47  ;;  %v3947_v46 = vpack.c.bf16 %v1660_v50, %v1659_v44 }
0x104e   :  { %3946 = vmatprep.subr.bf16.mxu1 %v4212_v2 }
0x1051   :  { %3948 = vmatpush3.bf16.msra.mxu1 %v3947_v46 }
0x1052   :  { %3949 = vmatprep.subr.bf16.mxu1 %v4212_v2 }
0x10b9   :  { %v2737_v30 = vpop.permute.xlu1 %2736 }
0x10ba   :  { %v2750_v53 = vsel %vm33_vm1, %v2747_v45, %v2737_v30  ;;  %v3950_v45 = vpack.c.bf16 %v1662_v48, %v1661_v33  ;;  %v1663_v30 = vld [vmem:[%s5238_s3 + $0x148] sm:$0xff] }
0x10bb   :  { %3789 = vmatmul.mubr.msk.f32.gmra.mrb[66].mxu1 %vm155_vm2, %v2750_v53  ;;  %v1664_v53 = vld [vmem:[%s5238_s3 + $0x150] sm:$0xff] }
0x10bc   :  { %3791 = vmatprep.mubr.msk.f32.mxu1 %vm4213_vm0, %v4214_v4  ;;  %3951 = vmatpush3.bf16.msra.mxu1 %v3950_v45  ;;  %v3262_v45 = vld [vmem:[%s5239_s4 + $0xf] ss:$0 sm:$0xff] }
0x10bd   :  { %v2739_v57 = vpop.permute.xlu0 %2738  ;;  %v2727_v58 = vpop.permute.xlu1 %2726  ;;  %3952 = vmatprep.subr.bf16.mxu1 %v4212_v2 }
0x10be   :  { %v2748_v51 = vsel %vm1229_vm8, %v2745_v55, %v2727_v58  ;;  %v3953_v55 = vpack.c.bf16 %v1664_v53, %v1663_v30 }
0x10bf   :  { %v2751_v37 = vsel %vm33_vm1, %v2748_v51, %v2739_v57 }
0x10c0   :  { %3792 = vmatmul.mubr.msk.f32.gmra.mrb[68].mxu1 %vm155_vm2, %v2751_v37 }
0x10c1   :  { %3827 = vmatprep.mubr.msk.f32.mxu1 %vm4213_vm0, %v4214_v4  ;;  %3954 = vmatpush3.bf16.msra.mxu1 %v3953_v55 }
0x10c3   :  { %v2831_v43 = vpop.f32.mrb[64].mxu1 }
0x10c4   :  { %v2832_v62 = vadd.f32 %v3247_v61, %v2831_v43  ;;  %v3787_v63 = vpop.f32.mrb[65].mxu1 }
0x10c6   :  { %v2845_v59 = vadd.f32 %v2832_v62, %v4793_v34  ;;  %v1655_v34 = vld [vmem:[%s5238_s3 + $0x108] sm:$0xff] }
0x10c7   :  { %v3941_v7 = vpack.c.bf16 %v1656_v56, %v1655_v34 }
0x10c8   :  { %v2848_v1 = vsel %vm155_vm2, %v2845_v59, 0.0 }
0x10c9   :  { %2849 = vadd.xlane.f32.xlu1 %v2848_v1  ;;  %3942 = vmatpush3.bf16.msra.mxu0 %v3941_v7 }
0x1156   :  { %v2850_v52 = vpop.xlane.xlu1 %2849 }
0x1157   :  { %v2857_v24 = vmul.f32 0.03125, %v2850_v52 }
0x1159   :  { %v2860_v5 = vsub.f32 %v2845_v59, %v2857_v24 }
0x115b   :  { %v2863_v49 = vmul.f32 %v2860_v5, %v2860_v5 }
0x115d   :  { %v2866_v54 = vsel %vm155_vm2, %v2863_v49, 0.0  ;;  %v3253_v49 = vld [vmem:[%s5239_s4 + $0xc] ss:$0 sm:$0xff] }
0x115e   :  { %2867 = vadd.xlane.f32.xlu0 %v2866_v54 }
0x118e   :  { %v2836_v23 = vpop.f32.mrb[66].mxu1 }
0x118f   :  { %v2837_v0 = vadd.f32 %v3247_v61, %v2836_v23  ;;  %v3790_v9 = vpop.f32.mrb[67].mxu1 }
0x1191   :  { %v2846_v3 = vadd.f32 %v2837_v0, %v4799_v60  ;;  %v3251_v60 = vld [vmem:[%s5239_s4 + $0xa] ss:$0 sm:$0xff] }
0x1193   :  { %v2841_v11 = vpop.f32.mrb[68].mxu1  ;;  %v2851_v17 = vsel %vm155_vm2, %v2846_v3, 0.0 }
0x1194   :  { %v2842_v12 = vadd.f32 %v3247_v61, %v2841_v11  ;;  %2852 = vadd.xlane.f32.xlu0 %v2851_v17  ;;  %v3793_v15 = vpop.f32.mrb[69].mxu1 }
0x1196   :  { %v2847_v41 = vadd.f32 %v2842_v12, %v4805_v27 }
0x1198   :  { %v2854_v10 = vsel %vm1338_vm9, %v2847_v41, 0.0 }
0x1199   :  { %2855 = vadd.xlane.f32.xlu1 %v2854_v10 }
0x11eb   :  { %v2868_v21 = vpop.xlane.xlu0 %2867 }
0x11ec   :  { %v2875_v8 = vmul.f32 0.03125, %v2868_v21 }
0x11ee   :  { %v2878_v16 = vadd.f32 1e-05, %v2875_v8 }
0x11f0   :  { %4171 = vrsqrt.f32 %v2878_v16 }
0x11fa   :  { %v4172_v13 = vpop.eup %4171 }
0x11fb   :  { %v2884_v25 = vmul.f32 %v4172_v13, %v2860_v5 }
0x11fd   :  { %v2891_v22 = vmul.f32 %v3251_v60, %v2884_v25 }
0x11ff   :  { %v5162_v26 = vadd.f32 %v3252_v20, %v2891_v22  ;;  %v3257_v22 = vld [vmem:[%s5239_s4 + $0xd] ss:$0 sm:$0xff] }
0x1201   :  { %3803 = vmatmul.mubr.msk.f32.vlgmr.msra.gmra.mrb[68].mxu0 %vm155_vm2, %v5162_v26 }
0x1202   :  { %3805 = vmatprep.mubr.msk.f32.mxu0 %vm4213_vm0, %v4214_v4 }
0x1221   :  { %v2853_v27 = vpop.xlane.xlu0 %2852 }
0x1222   :  { %v2858_v19 = vmul.f32 0.03125, %v2853_v27 }
0x1224   :  { %v2861_v14 = vsub.f32 %v2846_v3, %v2858_v19 }
0x1226   :  { %v2856_v28 = vpop.xlane.xlu1 %2855  ;;  %v2864_v29 = vmul.f32 %v2861_v14, %v2861_v14 }
0x1227   :  { %v2859_v18 = vmul.f32 0.03125, %v2856_v28 }
0x1228   :  { %v2869_v31 = vsel %vm155_vm2, %v2864_v29, 0.0 }
0x1229   :  { %v2862_v32 = vsub.f32 %v2847_v41, %v2859_v18  ;;  %2870 = vadd.xlane.f32.xlu0 %v2869_v31 }
0x122b   :  { %v2865_v35 = vmul.f32 %v2862_v32, %v2862_v32 }
0x122d   :  { %v2872_v40 = vsel %vm1338_vm9, %v2865_v35, 0.0 }
0x122e   :  { %2873 = vadd.xlane.f32.xlu1 %v2872_v40 }
0x12b6   :  { %v2871_v57 = vpop.xlane.xlu0 %2870 }
0x12b7   :  { %v2876_v58 = vmul.f32 0.03125, %v2871_v57 }
0x12b9   :  { %v2879_v51 = vadd.f32 1e-05, %v2876_v58 }
0x12bb   :  { %4173 = vrsqrt.f32 %v2879_v51  ;;  %v2874_v37 = vpop.xlane.xlu1 %2873 }
0x12bc   :  { %v2877_v61 = vmul.f32 0.03125, %v2874_v37 }
0x12be   :  { %v2880_v43 = vadd.f32 1e-05, %v2877_v61 }
0x12c0   :  { %4175 = vrsqrt.f32 %v2880_v43 }
0x12c5   :  { %v4174_v62 = vpop.eup %4173 }
0x12c6   :  { %v2885_v2 = vmul.f32 %v4174_v62, %v2861_v14 }
0x12c8   :  { %v2892_v63 = vmul.f32 %v3251_v60, %v2885_v2 }
0x12ca   :  { %v4176_v59 = vpop.eup %4175  ;;  %v2899_v1 = vadd.f32 %v3252_v20, %v2892_v63 }
0x12cb   :  { %v2886_v52 = vmul.f32 %v4176_v59, %v2862_v32 }
0x12cc   :  { %3806 = vmatmul.mubr.msk.f32.gmra.mrb[70].mxu0 %vm155_vm2, %v2899_v1 }
0x12cd   :  { %3808 = vmatprep.mubr.msk.f32.mxu0 %vm4213_vm0, %v4214_v4  ;;  %v2893_v24 = vmul.f32 %v3251_v60, %v2886_v52 }
0x12cf   :  { %v2900_v5 = vadd.f32 %v3252_v20, %v2893_v24 }
0x12d1   :  { %3809 = vmatmul.mubr.msk.f32.gmra.mrb[72].mxu0 %vm155_vm2, %v2900_v5 }
0x12d4   :  { %v2980_v54 = vpop.f32.mrb[68].mxu0 }
0x12d5   :  { %v2981_v6 = vadd.f32 %v3253_v49, %v2980_v54  ;;  %v3804_v38 = vpop.f32.mrb[69].mxu0 }
0x12d7   :  { %v2997_v36 = vmul.f32 0.70710677, %v2981_v6  ;;  %v2994_v56 = vmul.f32 0.5, %v2981_v6 }
0x12d9   :  { %4177 = verf.f32 %v2997_v36 }
0x12e3   :  { %v4178_v34 = vpop.eup %4177 }
0x12e4   :  { %v3003_v7 = vadd.f32 1.0, %v4178_v34 }
0x12e6   :  { %v3006_v23 = vmul.f32 %v3003_v7, %v2994_v56 }
0x12e8   :  { %3828 = vmatmul.mubr.msk.f32.vlgmr.msra.gmra.mrb[70].mxu1 %vm1499_vm10, %v3006_v23 }
0x12e9   :  { %3830 = vmatprep.mubr.msk.f32.mxu1 %vm4213_vm0, %v4214_v4 }
0x139f   :  { %v2985_v0 = vpop.f32.mrb[70].mxu0 }
0x13a0   :  { %v2986_v9 = vadd.f32 %v3253_v49, %v2985_v0  ;;  %v3807_v3 = vpop.f32.mrb[71].mxu0 }
0x13a2   :  { %v2998_v11 = vmul.f32 0.70710677, %v2986_v9  ;;  %v2995_v21 = vmul.f32 0.5, %v2986_v9 }
0x13a4   :  { %4179 = verf.f32 %v2998_v11  ;;  %v2990_v17 = vpop.f32.mrb[72].mxu0 }
0x13a5   :  { %v2991_v12 = vadd.f32 %v3253_v49, %v2990_v17  ;;  %v3810_v15 = vpop.f32.mrb[73].mxu0 }
0x13a7   :  { %v2999_v41 = vmul.f32 0.70710677, %v2991_v12  ;;  %v2996_v60 = vmul.f32 0.5, %v2991_v12 }
0x13a9   :  { %4181 = verf.f32 %v2999_v41 }
0x13ae   :  { %v4180_v10 = vpop.eup %4179 }
0x13af   :  { %v3004_v8 = vadd.f32 1.0, %v4180_v10 }
0x13b1   :  { %v3007_v16 = vmul.f32 %v3004_v8, %v2995_v21 }
0x13b3   :  { %v4182_v13 = vpop.eup %4181  ;;  %3831 = vmatmul.mubr.msk.f32.gmra.mrb[72].mxu1 %vm1499_vm10, %v3007_v16 }
0x13b4   :  { %v3005_v25 = vadd.f32 1.0, %v4182_v13  ;;  %3833 = vmatprep.mubr.msk.f32.mxu1 %vm4213_vm0, %v4214_v4 }
0x13b6   :  { %v3008_v20 = vmul.f32 %v3005_v25, %v2996_v60 }
0x13b8   :  { %3834 = vmatmul.mubr.msk.f32.gmra.mrb[74].mxu1 %vm1499_vm10, %v3008_v20 }
0x13bb   :  { %v3088_v27 = vpop.f32.mrb[70].mxu1 }
0x13bc   :  { %v3089_v19 = vadd.f32 %v3257_v22, %v3088_v27  ;;  %v3829_v14 = vpop.f32.mrb[71].mxu1 }
0x13be   :  { %v3100_v28 = vadd.f32 %v3089_v19, %v5162_v26  ;;  %v3261_v26 = vld [vmem:[%s5239_s4 + $0xe] ss:$0 sm:$0xff] }
0x13c0   :  { %v3101_v29 = vsel %vm155_vm2, %v3100_v28, 0.0 }
0x13c1   :  { %3102 = vadd.xlane.f32.xlu0 %v3101_v29 }
0x144e   :  { %v3103_v18 = vpop.xlane.xlu0 %3102 }
0x144f   :  { %v3104_v31 = vmul.f32 0.03125, %v3103_v18 }
0x1451   :  { %v3105_v32 = vsub.f32 %v3100_v28, %v3104_v31 }
0x1453   :  { %v3106_v35 = vmul.f32 %v3105_v32, %v3105_v32 }
0x1455   :  { %v3107_v4 = vsel %vm155_vm2, %v3106_v35, 0.0 }
0x1456   :  { %3108 = vadd.xlane.f32.xlu1 %v3107_v4 }
0x1486   :  { %v3093_v40 = vpop.f32.mrb[72].mxu1 }
0x1487   :  { %v3832_v42 = vpop.f32.mrb[73].mxu1 }
0x148b   :  { %v3097_v39 = vpop.f32.mrb[74].mxu1 }
0x148c   :  { %v3835_v47 = vpop.f32.mrb[75].mxu1 }
0x14e3   :  { %v3109_v44 = vpop.xlane.xlu1 %3108 }
0x14e4   :  { %v3110_v50 = vmul.f32 0.03125, %v3109_v44 }
0x14e6   :  { %v3111_v46 = vadd.f32 1e-05, %v3110_v50 }
0x14e8   :  { %4183 = vrsqrt.f32 %v3111_v46 }
0x14f2   :  { %v4184_v33 = vpop.eup %4183 }
0x14f3   :  { %v3113_v48 = vmul.f32 %v4184_v33, %v3105_v32 }
0x14f5   :  { %v3118_v30 = vmul.f32 %v3261_v26, %v3113_v48 }
0x14f7   :  { %v3123_v53 = vadd.f32 %v3262_v45, %v3118_v30 }
0x14f9   :  { %3125 = vst.msk [vmem:[#allocation2] sm:$0x3] %vm3124_vm11, %v3123_v53 }
0x14fa   :  { %4199 = shalt.err (!%p4196_p4)
}
0x14fb   :  { %s4200_s19 = scalar_lea.hbm %s5240_s5, 32 }
0x14fc   :  { %p4201_p5 = scmp.ne.s32.totalorder %s5240_s5, %s4200_s19  ;;  %p4204_p6 = scmp.lt.u32.totalorder %s4200_s19, %s5240_s5 }
0x14fe   :  { %p4206_p7 = pnand %p4204_p6, %p4201_p5 }
0x1500   :  { %4209 = shalt.err (!%p4206_p7)
}
0x1501   :  { %3135 = dma.vmem_to_hbm [thread:$0]  %s3133_s11, 32, %s5240_s5, [#allocation3]  }
0x1502   :  { %4210 = dma.done.wait [#allocation3], 32  }
0x1503   :  { %4211 = vsyncadd [#allocation3], 4294967264 }
0x1504   :  { %3139 = vsyncpa [#allocation3], 1 }

</bundles_post_ra>
